<compile_context>
chip_gen: v6e
topology: v6e:2x2x1
jax: 0.10.0
libtpu: 0.0.40
codegen_flags: <defaults>
</compile_context>

<pallas_src>
import functools

import jax
import jax.numpy as jnp
from jax.experimental import pallas as pl
from jax.experimental.pallas import tpu as pltpu


def _tconv_bnr_kernel(x_ref, w_ref, o_ref, *, H, W, OW, IC, OC, KH, KW, pad,
                      neg_slope, eps):
    # x_ref: (IC, H, W)              raw input block (one batch item)
    # w_ref: (2*OC, nA*KW*IC)        packed weights; rows = (row-parity, oc),
    #                                cols = (row-offset a, col-offset s, ic)
    # o_ref: (OC, OH*OW)             normalized output, spatial flattened on the lane axis
    nA = KH // 2 + 1                      # distinct padded-row offsets across both parities (=3)
    PW = KW - 1 - pad                     # left/right pad of the W-dilated plane (=2)
    Wd = 2 * (W - 1) + 1 + 2 * PW         # dilated + padded width (=35)

    # LeakyReLU(0.2) on the raw input (applied before any zero insertion -> exact).
    a = x_ref[...]
    a = jnp.where(a >= 0, a, neg_slope * a)

    # Stride-2 dilation + padding along W, done on the idle MXU with a 0/1 spread matrix:
    #   spread[j, PW + 2*j] = 1   ->   aw[ic, i, PW + 2*j] = a[ic, i, j], zeros elsewhere.
    rows = jax.lax.broadcasted_iota(jnp.int32, (W, Wd), 0)
    cols = jax.lax.broadcasted_iota(jnp.int32, (W, Wd), 1)
    spread = (cols == 2 * rows + PW).astype(a.dtype)
    aw = jnp.dot(a.reshape(IC * H, W), spread,
                 preferred_element_type=jnp.float32).reshape(IC, H, Wd)

    # One zero row above and below; the row-parity decomposition absorbs the rest of the
    # H-direction dilation/padding so no H dilation is materialised.
    zrow = jnp.zeros((IC, 1, Wd), jnp.float32)
    apad = jnp.concatenate([zrow, aw, zrow], axis=1)        # (IC, H+2, Wd)

    # im2col: 12 patches (row offset a0 in [0, nA), col offset s in [0, KW)), each
    # (IC, H, OW) flattened to lane-dense (IC, H*OW) columns ordered (m, ow).
    patches = []
    for a0 in range(nA):                                    # static, fully unrolled
        rowgrp = apad[:, a0:a0 + H, :]                      # (IC, H, Wd)
        for s in range(KW):
            patches.append(rowgrp[:, :, s:s + OW].reshape(IC, H * OW))
    col = jnp.concatenate(patches, axis=0)                  # (nA*KW*IC, H*OW) = (48, 512)

    # Single fused MXU matmul.  Rows 0..OC-1 -> even output rows (oh = 2m),
    # rows OC..2*OC-1 -> odd output rows (oh = 2m+1).
    y = jnp.dot(w_ref[...], col, preferred_element_type=jnp.float32)   # (2*OC, H*OW)
    y_even = y[:OC, :]
    y_odd = y[OC:, :]

    # Interleave even/odd output rows into the final lane-dense (OC, OH*OW) layout
    # (lane index = oh*OW + ow) using static lane slices + one lane concatenate.
    parts = []
    for m in range(H):                                      # static, fully unrolled
        parts.append(y_even[:, m * OW:(m + 1) * OW])
        parts.append(y_odd[:, m * OW:(m + 1) * OW])
    yfull = jnp.concatenate(parts, axis=1)                  # (OC, OH*OW)

    # InstanceNorm2d(affine=False): per-(n, c) stats over all spatial positions, biased var,
    # single-pass (sum + sum-of-squares).  ConvTranspose2d bias is elided (it cancels here).
    inv_hw = 1.0 / float(yfull.shape[1])
    mean = jnp.sum(yfull, axis=1, keepdims=True) * inv_hw
    ex2 = jnp.sum(yfull * yfull, axis=1, keepdims=True) * inv_hw
    var = ex2 - mean * mean
    o_ref[...] = ((yfull - mean) * jax.lax.rsqrt(var + eps)).astype(o_ref.dtype)


def _pack_weight(weight):
    """ConvTranspose2d weight (IC, OC, KH, KW) -> (2*OC, (KH//2+1)*KW*IC) parity-packed."""
    IC, OC, KH, KW = weight.shape
    nA = KH // 2 + 1
    w2 = jnp.zeros((2 * OC, nA * KW * IC), weight.dtype)
    wflip = weight[:, :, :, ::-1]                 # [ic, oc, kh, s]   (s = KW-1-kw)
    for ph in range(2):                           # output row parity
        for d in range(2):                        # which of the two contributing input rows
            a0 = ph + d                           # row offset into the 1-padded input
            kh = KH - 1 - ph - 2 * d
            blk = jnp.transpose(wflip[:, :, kh, :], (1, 2, 0)).reshape(OC, KW * IC)
            w2 = w2.at[ph * OC:(ph + 1) * OC,
                       a0 * KW * IC:(a0 + 1) * KW * IC].set(blk)
    return w2


def transpose_conv_bnr(x_nchw, weight, bias, *, stride=2, pad=1,
                       neg_slope=0.2, eps=1e-5):
    """Forward of TransposeConvBNR.  x_nchw: (N, IC, H, W); weight: (IC, OC, KH, KW)."""
    del bias  # InstanceNorm2d(affine=False) removes per-channel constants -> bias is a no-op.
    N, IC, H, W = x_nchw.shape
    IC_w, OC, KH, KW = weight.shape
    assert IC == IC_w
    assert stride == 2 and pad == 1 and KH == 4 and KW == 4, \
        "kernel specialised to the module defaults (kw=4, strides=2, pad=1)"
    OH = (H - 1) * stride - 2 * pad + KH
    OW = (W - 1) * stride - 2 * pad + KW

    # One-time weight repacking (tiny; would be precomputed/constant-folded in a real model).
    w2 = _pack_weight(weight)                     # (2*OC, 48)

    kernel = functools.partial(
        _tconv_bnr_kernel, H=H, W=W, OW=OW, IC=IC, OC=OC, KH=KH, KW=KW,
        pad=pad, neg_slope=neg_slope, eps=eps)

    # TODO(synk): on single-TC v5e/v6e, collapsing the batch into one grid step (col widened to
    # N*H*OW with per-item norm slices) removes ~0.35us/step overhead; kept grid=(N,) "parallel"
    # here so both v7x TensorCores are used.
    out_flat = pl.pallas_call(
        kernel,
        out_shape=jax.ShapeDtypeStruct((N, OC, OH * OW), x_nchw.dtype),
        grid_spec=pltpu.PrefetchScalarGridSpec(
            num_scalar_prefetch=0,
            grid=(N,),
            in_specs=[
                pl.BlockSpec((pl.Squeezed(), IC, H, W), lambda n: (n, 0, 0, 0)),
                pl.BlockSpec(w2.shape, lambda n: (0, 0)),
            ],
            out_specs=pl.BlockSpec((pl.Squeezed(), OC, OH * OW),
                                   lambda n: (n, 0, 0)),
        ),
        compiler_params=pltpu.CompilerParams(dimension_semantics=("parallel",)),
    )(x_nchw, w2)

    # Free row-major reshape (no transpose): (N, OC, OH*OW) -> (N, OC, OH, OW).
    return out_flat.reshape(N, OC, OH, OW)


def _reference(x_nchw, weight, bias, *, stride=2, pad=1, neg_slope=0.2, eps=1e-5):
    """Pure-JAX reference (XLA conv) for correctness checking."""
    a = jnp.where(x_nchw >= 0, x_nchw, neg_slope * x_nchw)
    KH, KW = weight.shape[2], weight.shape[3]
    rhs = jnp.transpose(weight[:, :, ::-1, ::-1], (1, 0, 2, 3))   # OIHW
    P = KH - 1 - pad
    y = jax.lax.conv_general_dilated(
        a, rhs, window_strides=(1, 1), padding=[(P, P), (P, P)],
        lhs_dilation=(stride, stride),
        dimension_numbers=('NCHW', 'OIHW', 'NCHW'))
    y = y + bias[None, :, None, None]
    mean = jnp.mean(y, axis=(2, 3), keepdims=True)
    var = jnp.mean((y - mean) ** 2, axis=(2, 3), keepdims=True)
    return (y - mean) * jax.lax.rsqrt(var + eps)


if __name__ == "__main__":
    key = jax.random.PRNGKey(0)
    k1, k2, k3 = jax.random.split(key, 3)

    N, IC, OC, H, W, KW_ = 2, 4, 8, 16, 16, 4
    x = jax.random.normal(k1, (N, IC, H, W), jnp.float32)
    # Deterministic parameter init (shapes match nn.ConvTranspose2d(IC, OC, 4, 2, 1)).
    bound = 1.0 / float((IC * KW_ * KW_) ** 0.5)
    weight = jax.random.uniform(k2, (IC, OC, KW_, KW_), jnp.float32, -bound, bound)
    bias = jax.random.uniform(k3, (OC,), jnp.float32, -bound, bound)

    out = transpose_conv_bnr(x, weight, bias)
    out = jax.block_until_ready(out)
    assert out.shape == (N, OC, 2 * H, 2 * W), out.shape

    ref = _reference(x, weight, bias)
    err = float(jnp.max(jnp.abs(out - ref)))
    assert err < 1e-3, f"max abs error vs reference: {err}"

    print("KERNEL_OK")
</pallas_src>

<mosaic_0001>
module attributes {stable_mosaic.version = 11 : i64} {
  func.func @_tconv_bnr_kernel(%arg0: i32, %arg1: memref<1x4x16x16xf32, #tpu.memory_space<vmem>>, %arg2: memref<16x48xf32, #tpu.memory_space<vmem>>, %arg3: memref<1x8x1024xf32, #tpu.memory_space<vmem>>) attributes {dimension_semantics = [#tpu.dimension_semantics<parallel>], iteration_bounds = array<i64: 2>, scalar_prefetch = 0 : i64, scratch_operands = 0 : i64, tpu.core_type = #tpu.core_type<tc>, window_params = [{transform_indices = @transform_0, window_bounds = array<i64: 1, 4, 16, 16>}, {pipeline_mode = #tpu.pipeline_mode<synchronous>, transform_indices = @transform_1, window_bounds = array<i64: 16, 48>}, {transform_indices = @transform_2, window_bounds = array<i64: 1, 8, 1024>}]} {
    %c0 = arith.constant 0 : index
    %c0_0 = arith.constant 0 : index
    %c0_1 = arith.constant 0 : index
    %c0_2 = arith.constant 0 : index
    %0 = vector.load %arg1[%c0, %c0_0, %c0_1, %c0_2] : memref<1x4x16x16xf32, #tpu.memory_space<vmem>>, vector<1x4x16x16xf32>
    %1 = vector.shape_cast %0 : vector<1x4x16x16xf32> to vector<4x16x16xf32>
    %cst = arith.constant 0.000000e+00 : f32
    %2 = vector.broadcast %cst : f32 to vector<4x16x16xf32>
    %3 = arith.cmpf oge, %1, %2 : vector<4x16x16xf32>
    %cst_3 = arith.constant 2.000000e-01 : f32
    %4 = vector.broadcast %cst_3 : f32 to vector<4x16x16xf32>
    %5 = arith.mulf %4, %1 : vector<4x16x16xf32>
    %6 = arith.select %3, %1, %5 : vector<4x16x16xi1>, vector<4x16x16xf32>
    %7 = tpu.iota {dimensions = array<i32: 0>} : vector<16x35xi32>
    %8 = tpu.iota {dimensions = array<i32: 1>} : vector<16x35xi32>
    %c2_i32 = arith.constant 2 : i32
    %9 = vector.broadcast %c2_i32 : i32 to vector<16x35xi32>
    %10 = arith.muli %9, %7 : vector<16x35xi32>
    %c2_i32_4 = arith.constant 2 : i32
    %11 = vector.broadcast %c2_i32_4 : i32 to vector<16x35xi32>
    %12 = arith.addi %10, %11 : vector<16x35xi32>
    %13 = arith.cmpi eq, %8, %12 : vector<16x35xi32>
    %14 = arith.extui %13 : vector<16x35xi1> to vector<16x35xi32>
    %15 = arith.sitofp %14 : vector<16x35xi32> to vector<16x35xf32>
    %16 = vector.shape_cast %6 : vector<4x16x16xf32> to vector<64x16xf32>
    %cst_5 = arith.constant dense<0.000000e+00> : vector<64x35xf32>
    %17 = tpu.matmul %16, %15, %cst_5 {dimension_numbers = #tpu.dot_dimension_numbers<[1], [0], [0], [1], [0, 0, 1, 1], [], []>} : vector<64x16xf32>, vector<16x35xf32>, vector<64x35xf32> -> vector<64x35xf32>
    %18 = vector.shape_cast %17 : vector<64x35xf32> to vector<4x16x35xf32>
    %cst_6 = arith.constant 0.000000e+00 : f32
    %19 = vector.broadcast %cst_6 : f32 to vector<4x1x35xf32>
    %20 = tpu.concatenate %19, %18, %19 in 1 : vector<4x1x35xf32>, vector<4x16x35xf32>, vector<4x1x35xf32> -> vector<4x18x35xf32>
    %21 = vector.extract_strided_slice %20 {offsets = [0, 0, 0], sizes = [4, 16, 35], strides = [1, 1, 1]} : vector<4x18x35xf32> to vector<4x16x35xf32>
    %22 = vector.extract_strided_slice %21 {offsets = [0, 0, 0], sizes = [4, 16, 32], strides = [1, 1, 1]} : vector<4x16x35xf32> to vector<4x16x32xf32>
    %23 = vector.shape_cast %22 : vector<4x16x32xf32> to vector<4x512xf32>
    %24 = vector.extract_strided_slice %21 {offsets = [0, 0, 1], sizes = [4, 16, 32], strides = [1, 1, 1]} : vector<4x16x35xf32> to vector<4x16x32xf32>
    %25 = vector.shape_cast %24 : vector<4x16x32xf32> to vector<4x512xf32>
    %26 = vector.extract_strided_slice %21 {offsets = [0, 0, 2], sizes = [4, 16, 32], strides = [1, 1, 1]} : vector<4x16x35xf32> to vector<4x16x32xf32>
    %27 = vector.shape_cast %26 : vector<4x16x32xf32> to vector<4x512xf32>
    %28 = vector.extract_strided_slice %21 {offsets = [0, 0, 3], sizes = [4, 16, 32], strides = [1, 1, 1]} : vector<4x16x35xf32> to vector<4x16x32xf32>
    %29 = vector.shape_cast %28 : vector<4x16x32xf32> to vector<4x512xf32>
    %30 = vector.extract_strided_slice %20 {offsets = [0, 1, 0], sizes = [4, 16, 35], strides = [1, 1, 1]} : vector<4x18x35xf32> to vector<4x16x35xf32>
    %31 = vector.extract_strided_slice %30 {offsets = [0, 0, 0], sizes = [4, 16, 32], strides = [1, 1, 1]} : vector<4x16x35xf32> to vector<4x16x32xf32>
    %32 = vector.shape_cast %31 : vector<4x16x32xf32> to vector<4x512xf32>
    %33 = vector.extract_strided_slice %30 {offsets = [0, 0, 1], sizes = [4, 16, 32], strides = [1, 1, 1]} : vector<4x16x35xf32> to vector<4x16x32xf32>
    %34 = vector.shape_cast %33 : vector<4x16x32xf32> to vector<4x512xf32>
    %35 = vector.extract_strided_slice %30 {offsets = [0, 0, 2], sizes = [4, 16, 32], strides = [1, 1, 1]} : vector<4x16x35xf32> to vector<4x16x32xf32>
    %36 = vector.shape_cast %35 : vector<4x16x32xf32> to vector<4x512xf32>
    %37 = vector.extract_strided_slice %30 {offsets = [0, 0, 3], sizes = [4, 16, 32], strides = [1, 1, 1]} : vector<4x16x35xf32> to vector<4x16x32xf32>
    %38 = vector.shape_cast %37 : vector<4x16x32xf32> to vector<4x512xf32>
    %39 = vector.extract_strided_slice %20 {offsets = [0, 2, 0], sizes = [4, 16, 35], strides = [1, 1, 1]} : vector<4x18x35xf32> to vector<4x16x35xf32>
    %40 = vector.extract_strided_slice %39 {offsets = [0, 0, 0], sizes = [4, 16, 32], strides = [1, 1, 1]} : vector<4x16x35xf32> to vector<4x16x32xf32>
    %41 = vector.shape_cast %40 : vector<4x16x32xf32> to vector<4x512xf32>
    %42 = vector.extract_strided_slice %39 {offsets = [0, 0, 1], sizes = [4, 16, 32], strides = [1, 1, 1]} : vector<4x16x35xf32> to vector<4x16x32xf32>
    %43 = vector.shape_cast %42 : vector<4x16x32xf32> to vector<4x512xf32>
    %44 = vector.extract_strided_slice %39 {offsets = [0, 0, 2], sizes = [4, 16, 32], strides = [1, 1, 1]} : vector<4x16x35xf32> to vector<4x16x32xf32>
    %45 = vector.shape_cast %44 : vector<4x16x32xf32> to vector<4x512xf32>
    %46 = vector.extract_strided_slice %39 {offsets = [0, 0, 3], sizes = [4, 16, 32], strides = [1, 1, 1]} : vector<4x16x35xf32> to vector<4x16x32xf32>
    %47 = vector.shape_cast %46 : vector<4x16x32xf32> to vector<4x512xf32>
    %48 = tpu.concatenate %23, %25, %27, %29, %32, %34, %36, %38, %41, %43, %45, %47 in 0 : vector<4x512xf32>, vector<4x512xf32>, vector<4x512xf32>, vector<4x512xf32>, vector<4x512xf32>, vector<4x512xf32>, vector<4x512xf32>, vector<4x512xf32>, vector<4x512xf32>, vector<4x512xf32>, vector<4x512xf32>, vector<4x512xf32> -> vector<48x512xf32>
    %c0_7 = arith.constant 0 : index
    %c0_8 = arith.constant 0 : index
    %49 = vector.load %arg2[%c0_7, %c0_8] : memref<16x48xf32, #tpu.memory_space<vmem>>, vector<16x48xf32>
    %cst_9 = arith.constant dense<0.000000e+00> : vector<16x512xf32>
    %50 = tpu.matmul %49, %48, %cst_9 {dimension_numbers = #tpu.dot_dimension_numbers<[1], [0], [0], [1], [0, 0, 1, 1], [], []>} : vector<16x48xf32>, vector<48x512xf32>, vector<16x512xf32> -> vector<16x512xf32>
    %51 = vector.extract_strided_slice %50 {offsets = [0, 0], sizes = [8, 512], strides = [1, 1]} : vector<16x512xf32> to vector<8x512xf32>
    %52 = vector.extract_strided_slice %50 {offsets = [8, 0], sizes = [8, 512], strides = [1, 1]} : vector<16x512xf32> to vector<8x512xf32>
    %53 = vector.extract_strided_slice %51 {offsets = [0, 0], sizes = [8, 32], strides = [1, 1]} : vector<8x512xf32> to vector<8x32xf32>
    %54 = vector.extract_strided_slice %52 {offsets = [0, 0], sizes = [8, 32], strides = [1, 1]} : vector<8x512xf32> to vector<8x32xf32>
    %55 = vector.extract_strided_slice %51 {offsets = [0, 32], sizes = [8, 32], strides = [1, 1]} : vector<8x512xf32> to vector<8x32xf32>
    %56 = vector.extract_strided_slice %52 {offsets = [0, 32], sizes = [8, 32], strides = [1, 1]} : vector<8x512xf32> to vector<8x32xf32>
    %57 = vector.extract_strided_slice %51 {offsets = [0, 64], sizes = [8, 32], strides = [1, 1]} : vector<8x512xf32> to vector<8x32xf32>
    %58 = vector.extract_strided_slice %52 {offsets = [0, 64], sizes = [8, 32], strides = [1, 1]} : vector<8x512xf32> to vector<8x32xf32>
    %59 = vector.extract_strided_slice %51 {offsets = [0, 96], sizes = [8, 32], strides = [1, 1]} : vector<8x512xf32> to vector<8x32xf32>
    %60 = vector.extract_strided_slice %52 {offsets = [0, 96], sizes = [8, 32], strides = [1, 1]} : vector<8x512xf32> to vector<8x32xf32>
    %61 = vector.extract_strided_slice %51 {offsets = [0, 128], sizes = [8, 32], strides = [1, 1]} : vector<8x512xf32> to vector<8x32xf32>
    %62 = vector.extract_strided_slice %52 {offsets = [0, 128], sizes = [8, 32], strides = [1, 1]} : vector<8x512xf32> to vector<8x32xf32>
    %63 = vector.extract_strided_slice %51 {offsets = [0, 160], sizes = [8, 32], strides = [1, 1]} : vector<8x512xf32> to vector<8x32xf32>
    %64 = vector.extract_strided_slice %52 {offsets = [0, 160], sizes = [8, 32], strides = [1, 1]} : vector<8x512xf32> to vector<8x32xf32>
    %65 = vector.extract_strided_slice %51 {offsets = [0, 192], sizes = [8, 32], strides = [1, 1]} : vector<8x512xf32> to vector<8x32xf32>
    %66 = vector.extract_strided_slice %52 {offsets = [0, 192], sizes = [8, 32], strides = [1, 1]} : vector<8x512xf32> to vector<8x32xf32>
    %67 = vector.extract_strided_slice %51 {offsets = [0, 224], sizes = [8, 32], strides = [1, 1]} : vector<8x512xf32> to vector<8x32xf32>
    %68 = vector.extract_strided_slice %52 {offsets = [0, 224], sizes = [8, 32], strides = [1, 1]} : vector<8x512xf32> to vector<8x32xf32>
    %69 = vector.extract_strided_slice %51 {offsets = [0, 256], sizes = [8, 32], strides = [1, 1]} : vector<8x512xf32> to vector<8x32xf32>
    %70 = vector.extract_strided_slice %52 {offsets = [0, 256], sizes = [8, 32], strides = [1, 1]} : vector<8x512xf32> to vector<8x32xf32>
    %71 = vector.extract_strided_slice %51 {offsets = [0, 288], sizes = [8, 32], strides = [1, 1]} : vector<8x512xf32> to vector<8x32xf32>
    %72 = vector.extract_strided_slice %52 {offsets = [0, 288], sizes = [8, 32], strides = [1, 1]} : vector<8x512xf32> to vector<8x32xf32>
    %73 = vector.extract_strided_slice %51 {offsets = [0, 320], sizes = [8, 32], strides = [1, 1]} : vector<8x512xf32> to vector<8x32xf32>
    %74 = vector.extract_strided_slice %52 {offsets = [0, 320], sizes = [8, 32], strides = [1, 1]} : vector<8x512xf32> to vector<8x32xf32>
    %75 = vector.extract_strided_slice %51 {offsets = [0, 352], sizes = [8, 32], strides = [1, 1]} : vector<8x512xf32> to vector<8x32xf32>
    %76 = vector.extract_strided_slice %52 {offsets = [0, 352], sizes = [8, 32], strides = [1, 1]} : vector<8x512xf32> to vector<8x32xf32>
    %77 = vector.extract_strided_slice %51 {offsets = [0, 384], sizes = [8, 32], strides = [1, 1]} : vector<8x512xf32> to vector<8x32xf32>
    %78 = vector.extract_strided_slice %52 {offsets = [0, 384], sizes = [8, 32], strides = [1, 1]} : vector<8x512xf32> to vector<8x32xf32>
    %79 = vector.extract_strided_slice %51 {offsets = [0, 416], sizes = [8, 32], strides = [1, 1]} : vector<8x512xf32> to vector<8x32xf32>
    %80 = vector.extract_strided_slice %52 {offsets = [0, 416], sizes = [8, 32], strides = [1, 1]} : vector<8x512xf32> to vector<8x32xf32>
    %81 = vector.extract_strided_slice %51 {offsets = [0, 448], sizes = [8, 32], strides = [1, 1]} : vector<8x512xf32> to vector<8x32xf32>
    %82 = vector.extract_strided_slice %52 {offsets = [0, 448], sizes = [8, 32], strides = [1, 1]} : vector<8x512xf32> to vector<8x32xf32>
    %83 = vector.extract_strided_slice %51 {offsets = [0, 480], sizes = [8, 32], strides = [1, 1]} : vector<8x512xf32> to vector<8x32xf32>
    %84 = vector.extract_strided_slice %52 {offsets = [0, 480], sizes = [8, 32], strides = [1, 1]} : vector<8x512xf32> to vector<8x32xf32>
    %85 = tpu.concatenate %53, %54, %55, %56, %57, %58, %59, %60, %61, %62, %63, %64, %65, %66, %67, %68 in 1 : vector<8x32xf32>, vector<8x32xf32>, vector<8x32xf32>, vector<8x32xf32>, vector<8x32xf32>, vector<8x32xf32>, vector<8x32xf32>, vector<8x32xf32>, vector<8x32xf32>, vector<8x32xf32>, vector<8x32xf32>, vector<8x32xf32>, vector<8x32xf32>, vector<8x32xf32>, vector<8x32xf32>, vector<8x32xf32> -> vector<8x512xf32>
    %86 = tpu.concatenate %69, %70, %71, %72, %73, %74, %75, %76, %77, %78, %79, %80, %81, %82, %83, %84 in 1 : vector<8x32xf32>, vector<8x32xf32>, vector<8x32xf32>, vector<8x32xf32>, vector<8x32xf32>, vector<8x32xf32>, vector<8x32xf32>, vector<8x32xf32>, vector<8x32xf32>, vector<8x32xf32>, vector<8x32xf32>, vector<8x32xf32>, vector<8x32xf32>, vector<8x32xf32>, vector<8x32xf32>, vector<8x32xf32> -> vector<8x512xf32>
    %87 = tpu.concatenate %85, %86 in 1 : vector<8x512xf32>, vector<8x512xf32> -> vector<8x1024xf32>
    %cst_10 = arith.constant dense<0.000000e+00> : vector<8xf32>
    %88 = vector.multi_reduction <add>, %87, %cst_10 [1] : vector<8x1024xf32> to vector<8xf32>
    %89 = vector.shape_cast %88 : vector<8xf32> to vector<8x1xf32>
    %cst_11 = arith.constant 9.765625E-4 : f32
    %90 = vector.broadcast %cst_11 : f32 to vector<8x1xf32>
    %91 = arith.mulf %89, %90 : vector<8x1xf32>
    %92 = arith.mulf %87, %87 : vector<8x1024xf32>
    %cst_12 = arith.constant dense<0.000000e+00> : vector<8xf32>
    %93 = vector.multi_reduction <add>, %92, %cst_12 [1] : vector<8x1024xf32> to vector<8xf32>
    %94 = vector.shape_cast %93 : vector<8xf32> to vector<8x1xf32>
    %cst_13 = arith.constant 9.765625E-4 : f32
    %95 = vector.broadcast %cst_13 : f32 to vector<8x1xf32>
    %96 = arith.mulf %94, %95 : vector<8x1xf32>
    %97 = arith.mulf %91, %91 : vector<8x1xf32>
    %98 = arith.subf %96, %97 : vector<8x1xf32>
    %99 = vector.broadcast %91 : vector<8x1xf32> to vector<8x1024xf32>
    %100 = arith.subf %87, %99 : vector<8x1024xf32>
    %cst_14 = arith.constant 9.99999974E-6 : f32
    %101 = vector.broadcast %cst_14 : f32 to vector<8x1xf32>
    %102 = arith.addf %98, %101 : vector<8x1xf32>
    %103 = math.rsqrt %102 : vector<8x1xf32>
    %104 = vector.broadcast %103 : vector<8x1xf32> to vector<8x1024xf32>
    %105 = arith.mulf %100, %104 : vector<8x1024xf32>
    %c0_15 = arith.constant 0 : index
    %c0_16 = arith.constant 0 : index
    %c0_17 = arith.constant 0 : index
    %106 = vector.load %arg3[%c0_15, %c0_16, %c0_17] : memref<1x8x1024xf32, #tpu.memory_space<vmem>>, vector<1x8x1024xf32>
    %107 = vector.shape_cast %106 : vector<1x8x1024xf32> to vector<8x1024xf32>
    %108 = vector.shape_cast %105 : vector<8x1024xf32> to vector<1x8x1024xf32>
    tpu.vector_store %arg3[%c0_15, %c0_16, %c0_17], %108 {strides = array<i32>} : memref<1x8x1024xf32, #tpu.memory_space<vmem>>, vector<1x8x1024xf32>,
    return
  }
  func.func @transform_0(%arg0: i32) -> (i32, i32, i32, i32) {
    %c0_i32 = arith.constant 0 : i32
    %c0_i32_0 = arith.constant 0 : i32
    %c0_i32_1 = arith.constant 0 : i32
    %c0_i32_2 = arith.constant 0 : i32
    return %arg0, %c0_i32, %c0_i32_0, %c0_i32_1 : i32, i32, i32, i32
  }
  func.func @transform_1(%arg0: i32) -> (i32, i32) {
    %c0_i32 = arith.constant 0 : i32
    %c0_i32_0 = arith.constant 0 : i32
    %c0_i32_1 = arith.constant 0 : i32
    return %c0_i32, %c0_i32_0 : i32, i32
  }
  func.func @transform_2(%arg0: i32) -> (i32, i32, i32) {
    %c0_i32 = arith.constant 0 : i32
    %c0_i32_0 = arith.constant 0 : i32
    %c0_i32_1 = arith.constant 0 : i32
    return %arg0, %c0_i32, %c0_i32_0 : i32, i32, i32
  }
}

</mosaic_0001>

<bundles_post_ra>
// kernel: tpu_custom_call.1
= control target key start
LH: loop header
LB: loop body
LE: loop exit
PB: predicated region body
PF: predicated region fallthrough
CT: control target
= control target key end

     0   :  { %7 = vsyncpa [#allocation3], 0  ;;  %s6232_s0 = inlined_call_operand.hbm [shape: f32[2,4,16,16], index: 0, kind: input, shape index: {}]   ;;  %s6233_s1 = inlined_call_operand.hbm [shape: f32[16,48], index: 1, kind: input, shape index: {}]   ;;  %s6234_s2 = inlined_call_operand.hbm [shape: f32[2,8,1024], index: 2, kind: output, shape index: {}]  }
   0x1   :  { %9 = vsyncpa [#allocation3 + $0x1], 0 }
   0x2   :  { %10 = vsyncpa [#allocation6], 0 }
   0x3   :  { %11 = vsyncpa [#allocation4], 0 }
   0x4   :  { %13 = vsyncpa [#allocation4 + $0x1], 0  ;;  %s3836_s9 = smov 0   ;;  %s3838_s10 = smov 0  }
   0x5   :  { %s3840_s11 = smov 0   ;;  %s3842_s12 = smov 0  }
   0x6 LB: > { %s3857_s13 = sadd.s32 4294967295, %s3804_s12   ;;  %s3547_s14 = sadd.s32 4294967294, %s3804_s12   ;;  %s3804_s12 = sphi %s3842_s12, %s6571_s12   ;;  %s3800_s11 = sphi %s3840_s11, %s6570_s11   ;;  %s3796_s10 = sphi %s3838_s10, %s6569_s10   ;;  %s3792_s9 = sphi %s3836_s9, %s6568_s9  }
   0x7   : > { %p39_p0 = scmp.ne.s32.totalorder %s3796_s10, %s3792_s9  ;;  %p6235_p1 = scmp.eq.s32.totalorder %s3857_s13, 0 }
   0x8   : > { %p90_p3 = scmp.eq.s32.totalorder %s3547_s14, 1  ;;  %p3548_p5 = scmp.ge.s32.totalorder %s3804_s12, 1 }
   0x9   : > { %p3866_p4 = por %p6235_p1, %p39_p0  ;;  %p97_p7 = scmp.lt.s32.totalorder %s3804_s12, 3 }
   0xa   : > { %p3871_p6 = por %p90_p3, %p39_p0  ;;  %s3806_s18 = smov [#allocation5]  }
   0xb   : > { %s6318_s15 = scalar_select %p3866_p4, 1, 0 }
   0xc   : > { %s6319_s16 = scalar_select %p3871_p6, 1, 0 }
   0xd   : > { %p3876_p8 = pnand %p3548_p5, %p97_p7  ;;  %s109_s19 = sshll.u32 %s3806_s18, 4  ;;  %s110_s19 = int_to_ptr.vmem [resolvable:$true] %s109_s19 }
   0xe   : > { %s3890_s21 = sadd.s32 1, %s3804_s12   ;;  %s26_s22 = sadd.s32 1, %s3800_s11 }
   0xf   : > { %s6320_s17 = scalar_select %p3876_p8, 1, 0 }
  0x10   : > { %p3619_p9 = pneg %p3876_p8  ;;  %s23_s23 = ssub.s32 %s3804_s12, %s3890_s21 }
  0x11   : > { %s3693_s24 = scalar_lea.vmem %s110_s19, 256  ;;  %p3701_p5 = scmp.lt.s32.totalorder %s110_s19, %s110_s19 }
  0x12   : > { %p3885_p11 = pnand %p3619_p9, %p6235_p1  ;;  %p3694_p13 = scmp.ne.s32.totalorder %s110_s19, %s3693_s24 }
  0x13   : > { %p3702_p7 = scmp.lt.s32.totalorder %s3693_s24, %s3693_s24 }
  0x14   : > { %p3684_p12 = pneg %p3885_p11 }
  0x15   : > { %p3703_p10 = por %p3702_p7, %p3701_p5 }
  0x16   : > { %p3696_p0 = pnand %p3694_p13, %p3684_p12 }
  0x18   : > { %p3697_p3 = pneg %p3696_p0 }
  0x1a   : > { %p3704_p2 = pnand %p3703_p10, %p3697_p3 }
  0x1c   : > { %3707 = shalt.err (!%p3704_p2)
}
  0x1d   : > { %s3807_s25 = smov 128   ;;  %s3808_s26 = smov 8  }
  0x1e   : > { %3622 = dma.hbm_to_vmem [thread:$0]  (!%p3885_p11), %s6233_s1, 256, %s110_s19, [#allocation6], %s3807_s25, %s3807_s25, %s3808_s26  }
  0x1f   : > { %p24_p2 = scmp.eq.s32.totalorder %s23_s23, 0  ;;  %p33_p9 = scmp.ne.s32.totalorder %s3800_s11, %s3796_s10 }
  0x20   : > { %p34_p10 = scmp.eq.s32.totalorder %s3804_s12, 0  ;;  %p3632_p12 = scmp.lt.s32.totalorder %s3804_s12, 2 }
  0x21   : > { %s3910_s29 = scalar_select %p24_p2, %s3800_s11, %s26_s22  }
  0x22   : > { %p35_p13 = por %p34_p10, %p33_p9  ;;  %p6322_p0 = scmp.eq.s32.totalorder %s3857_s13, 1 }
  0x23   : > { %s123_s3 = sand.u32 1, %s3800_s11   ;;  %s3579_s4 = sshll.u32 %s3804_s12, 10 }
  0x24   : > { %p3914_p3 = por %p6322_p0, %p33_p9  ;;  %s3551_s5 = sshll.u32 %s123_s3, 6 }
  0x25   : > { %s3923_s8 = scalar_lea.hbm %s6232_s0, %s3579_s4  ;;  %s127_s14 = scalar_lea.vmem [#allocation2], %s3551_s5 }
  0x26   : > { %s6323_s30 = scalar_select %p3914_p3, 1, 0 }
  0x27   : > { %s134_s18 = sshll.u32 %s127_s14, 4  ;;  %p3925_p11 = pnand %p3632_p12, %p35_p13  ;;  %s3929_s18 = int_to_ptr.vmem [resolvable:$true] %s134_s18 }
  0x28   : > { %s3931_s20 = scalar_lea.sflag [#allocation3], %s123_s3  ;;  %s3708_s22 = scalar_lea.hbm %s3923_s8, 1024 }
  0x29   : > { %p3709_p5 = scmp.ne.s32.totalorder %s3923_s8, %s3708_s22  ;;  %p3710_p7 = pneg %p3925_p11 }
  0x2a   : > { %s3713_s27 = scalar_lea.hbm %s6232_s0, 2048  ;;  %p3714_p10 = scmp.lt.s32.totalorder %s3923_s8, %s6232_s0 }
  0x2b   : > { %p3711_p2 = pnand %p3710_p7, %p3709_p5  ;;  %p3715_p12 = scmp.lt.s32.totalorder %s3713_s27, %s3708_s22 }
  0x2d   : > { %p3712_p9 = pneg %p3711_p2  ;;  %p3716_p13 = por %p3715_p12, %p3714_p10 }
  0x2f   : > { %p3717_p0 = pnand %p3716_p13, %p3712_p9 }
  0x31   : > { %3720 = shalt.err (!%p3717_p0)
}
  0x32   : > { %s3721_s3 = scalar_lea.vmem %s3929_s18, 1024  ;;  %s3809_s5 = smov [#allocation2]  }
  0x33   : > { %p3722_p1 = scmp.ne.s32.totalorder %s3929_s18, %s3721_s3  ;;  %s3726_s6 = sshll.u32 %s3809_s5, 4  ;;  %s3727_s6 = int_to_ptr.vmem [resolvable:$false] %s3726_s6 }
  0x34   : > { %s3728_s7 = scalar_lea.vmem %s3727_s6, 2048  ;;  %p3729_p2 = scmp.lt.s32.totalorder %s3929_s18, %s3727_s6 }
  0x35   : > { %p3724_p6 = pnand %p3722_p1, %p3710_p7  ;;  %p3730_p3 = scmp.lt.s32.totalorder %s3728_s7, %s3721_s3 }
  0x37   : > { %p3725_p5 = pneg %p3724_p6  ;;  %p3731_p4 = por %p3730_p3, %p3729_p2 }
  0x39   : > { %p3732_p8 = pnand %p3731_p4, %p3725_p5 }
  0x3b   : > { %3735 = shalt.err (!%p3732_p8)
}
  0x3c   : > { %3626 = dma.hbm_to_vmem [thread:$0]  (!%p3925_p11), %s3923_s8, 1024, %s3929_s18, %s3931_s20, %s3807_s25, %s3807_s25, %s3808_s26  }
  0x3d   : > { %p6325_p1 = scmp.ne.s32.totalorder %s6320_s17, 0 }
  0x3f   : > { %146 = sbr.rel (%p6325_p1) target bundleno = 1406 (0x57e), region = 28 }
  0x44   : > { %s3958_s14 = sand.u32 1, %s3796_s10   ;;  %p6326_p4 = scmp.ne.s32.totalorder %s6318_s15, 0 }
  0x45   : > { %s3555_s22 = sshll.u32 %s3958_s14, 6  ;;  %s149_s23 = scalar_lea.sflag [#allocation3], %s3958_s14 }
  0x46   : > { %s3964_s19 = scalar_lea.vmem [#allocation2], %s3555_s22 }
  0x47   : > { %3779 = dma.done.wait (%p6326_p4), %s149_s23, 1024  }
  0x48   : > { %3781 = vsyncadd (%p6326_p4), %s149_s23, 4294966272  ;;  %p6327_p6 = scmp.eq.s32.totalorder %s3857_s13, 0 }
  0x4a   : > { %3783 = dma.done.wait (%p6327_p6), [#allocation6], 256   ;;  %p6328_p8 = pmov %p6327_p6 }
  0x4b   : > { %v209_v0 = vlaneseq  ;;  %v177_v7 = vld [vmem:[%s3964_s19] sm:$0xff]  ;;  %v183_v8 = vld [vmem:[%s3964_s19 + $0x30] sm:$0xff]  ;;  %v178_v9 = vld [vmem:[%s3964_s19 + $0x8] sm:$0xff]  ;;  %v3810_v18 = vmov 1.0   ;;  %vm224_vm7 = vcmask 130048   ;;  %v6244_v33 = vmov 0.0  }
  0x4c   : > { %3785 = vsyncadd (%p6328_p8), [#allocation6], 4294967040  ;;  %v193_v11 = vmul.f32 0.2, %v177_v7  ;;  %v184_v12 = vld [vmem:[%s3964_s19 + $0x38] sm:$0xff]  ;;  %v179_v13 = vld [vmem:[%s3964_s19 + $0x10] sm:$0xff] }
  0x4d   : > { %v3974_v1 = vshrl.u32 %v209_v0, 7  ;;  %v213_v4 = vand.u32 127, %v209_v0  ;;  %vm185_vm1 = vcmp.ge.f32.partialorder %v177_v7, 0.0  ;;  %vm191_vm2 = vcmp.ge.f32.partialorder %v183_v8, 0.0  ;;  %v180_v17 = vld [vmem:[%s3964_s19 + $0x18] sm:$0xff]  ;;  %v181_v20 = vld [vmem:[%s3964_s19 + $0x20] sm:$0xff] }
  0x4e   : > { %v199_v14 = vmul.f32 0.2, %v183_v8  ;;  %v194_v15 = vmul.f32 0.2, %v178_v9  ;;  %vm186_vm4 = vcmp.ge.f32.partialorder %v178_v9, 0.0  ;;  %vm192_vm5 = vcmp.ge.f32.partialorder %v184_v12, 0.0 }
  0x4f   : > { %v211_v2 = vadd.s32 8, %v3974_v1  ;;  %v214_v3 = vmul.u32 2, %v3974_v1  ;;  %v200_v16 = vmul.f32 0.2, %v184_v12  ;;  %vm187_vm6 = vcmp.ge.f32.partialorder %v179_v13, 0.0  ;;  %v182_v28 = vld [vmem:[%s3964_s19 + $0x28] sm:$0xff] }
  0x50   : > { %v195_v19 = vmul.f32 0.2, %v179_v13  ;;  %v201_v21 = vsel %vm185_vm1, %v177_v7, %v193_v11  ;;  %v207_v22 = vsel %vm191_vm2, %v183_v8, %v199_v14  ;;  %v202_v23 = vsel %vm186_vm4, %v178_v9, %v194_v15  ;;  %s3813_s15 = smov 125   ;;  %s3814_s17 = smov 127  }
  0x51   : > { %v215_v5 = vmul.u32 2, %v211_v2  ;;  %v216_v6 = vadd.s32 2, %v214_v3  ;;  %v208_v24 = vsel %vm192_vm5, %v184_v12, %v200_v16  ;;  %v196_v25 = vmul.f32 0.2, %v180_v17  ;;  %3595 = vmatprep.mubr.msk.f32.mxu0 %vm224_vm7, %v201_v21  ;;  %3604 = vmatprep.mubr.msk.f32.mxu1 %vm224_vm7, %v207_v22  ;;  %s3815_s25 = smov 126   ;;  %s3817_s26 = smov 32  }
  0x52   : > { %v203_v26 = vsel %vm187_vm6, %v179_v13, %v195_v19  ;;  %vm188_vm8 = vcmp.ge.f32.partialorder %v180_v17, 0.0  ;;  %v197_v27 = vmul.f32 0.2, %v181_v20  ;;  %vm189_vm9 = vcmp.ge.f32.partialorder %v181_v20, 0.0  ;;  %s3818_s8 = smov 64   ;;  %s3819_s18 = smov 96  }
  0x53   : > { %v217_v10 = vadd.s32 2, %v215_v5  ;;  %vm218_vm0 = vcmp.eq.s32.totalorder %v213_v4, %v216_v6  ;;  %v204_v29 = vsel %vm188_vm8, %v180_v17, %v196_v25  ;;  %v198_v30 = vmul.f32 0.2, %v182_v28  ;;  %s3580_s20 = sshll.u32 %s3857_s13, 10  ;;  %s176_s24 = scalar_lea.vmem [#allocation7], %s3555_s22 }
  0x54   : > { %v205_v31 = vsel %vm189_vm9, %v181_v20, %v197_v27  ;;  %vm190_vm10 = vcmp.ge.f32.partialorder %v182_v28, 0.0  ;;  %v3812_v34 = vmov 1983009808   ;;  %vm362_vm11 = vcmask 1040384   ;;  %s3467_s27 = sshll.u32 %s176_s24, 4  ;;  %s6189_s4 = scalar_lea.hbm %s6234_s2, %s3580_s20  ;;  %s6191_s27 = int_to_ptr.vmem [resolvable:$true] %s3467_s27 }
  0x55   : > { %vm219_vm3 = vcmp.eq.s32.totalorder %v213_v4, %v217_v10  ;;  %v206_v32 = vsel %vm190_vm10, %v182_v28, %v198_v30  ;;  %v398_v35 = vunpack.c.l.s4 %v3812_v34  ;;  %vm2147_vm12 = vcmask 1045504   ;;  %s3453_s3 = scalar_lea.sflag [#allocation4], %s3958_s14  ;;  %s3736_s5 = scalar_lea.vmem %s6191_s27, 1024 }
  0x56   : > { %3591 = vmatprep.subr.msk.mxu0 %vm219_vm3, %v3810_v18  ;;  %3607 = vmatprep.subr.msk.mxu1 %vm219_vm3, %v3810_v18  ;;  %vm1262_vm13 = vcmask 1046528   ;;  %vm579_vm14 = vcmask 261120   ;;  %vm581_vm15 = vcmask 523264   ;;  %vm3104_vm1 = vcmask 1043456   ;;  %p3737_p3 = scmp.ne.s32.totalorder %s6191_s27, %s3736_s5  ;;  %p6565_p11 = scmp.ne.s32.totalorder %s6323_s30, 0 }
  0x57   : > { %3592 = vmatpush3.msk.msra.mxu0 %vm219_vm3, %v3810_v18  ;;  %3609 = vmatpush3.msk.msra.mxu1 %vm219_vm3, %v3810_v18  ;;  %v399_v42 = vunpack.c.0.s8 %v398_v35  ;;  %vm3131_vm2 = vcmask 392192   ;;  %s3820_s6 = smov [#allocation7]  }
  0x58   : > { %3593 = vmatprep.subr.msk.mxu0 %vm218_vm0, %v3810_v18  ;;  %3608 = vmatprep.subr.msk.mxu1 %vm218_vm0, %v3810_v18  ;;  %p3738_p7 = pnand %p3737_p3, %p6565_p11  ;;  %s3740_s7 = sshll.u32 %s3820_s6, 4  ;;  %s3741_s7 = int_to_ptr.vmem [resolvable:$false] %s3740_s7 }
  0x59   : > { %3594 = vmatpush3.msk.msra.mxu0 %vm218_vm0, %v3810_v18  ;;  %3610 = vmatpush3.msk.msra.mxu1 %vm218_vm0, %v3810_v18  ;;  %v4021_v52 = vsub.s32 %v399_v42, %v3974_v1  ;;  %vm583_vm0 = vcmask 785408   ;;  %s3742_s22 = scalar_lea.vmem %s3741_s7, 2048  ;;  %p3743_p10 = scmp.lt.s32.totalorder %s6191_s27, %s3741_s7 }
  0x5a   : > { %3596 = vmatmul.mubr.msk.f32.vlgmr.msra.gmra.mxu0 %vm224_vm7, %v202_v23  ;;  %3605 = vmatmul.mubr.msk.f32.vlgmr.msra.gmra.mxu1 %vm224_vm7, %v208_v24  ;;  %p3739_p9 = pneg %p3738_p7  ;;  %p3744_p12 = scmp.lt.s32.totalorder %s3742_s22, %s3736_s5 }
  0x5b   : > { %3598 = vmatprep.mubr.msk.f32.mxu0 %vm224_vm7, %v203_v26  ;;  %3202 = vmatprep.mubr.f32.mxu1 %v6244_v33 }
  0x5c   : > { %p3745_p13 = por %p3744_p12, %p3743_p10 }
  0x5e   : > { %3599 = vmatmul.mubr.msk.f32.gmra.mxu0 %vm224_vm7, %v204_v29  ;;  %p3746_p0 = pnand %p3745_p13, %p3739_p9 }
  0x5f   : > { %3601 = vmatprep.mubr.msk.f32.mxu0 %vm224_vm7, %v205_v31 }
  0x62   : > { %3602 = vmatmul.mubr.msk.f32.gmra.mxu0 %vm224_vm7, %v206_v32 }
  0x63   : > { %3279 = vmatprep.mubr.f32.mxu0 %v6244_v33 }
 0x11a   : > { %v3597_v36 = vpop.f32.mrf.mxu0  ;;  %v3606_v37 = vpop.f32.mrf.mxu1 }
 0x11b   : > { %v364_v38 = vrot.slane %v3597_v36, 7  ;;  %v373_v39 = vrot.slane %v3606_v37, 7 }
 0x11c   : > { %v315_v40 = vpop.f32.mrf.mxu0  ;;  %v345_v41 = vpop.f32.mrf.mxu1 }
 0x11d   : > { %v363_v43 = vrot.slane %v315_v40, 7  ;;  %v372_v44 = vrot.slane %v345_v41, 7  ;;  %v4011_v48 = vsel %vm362_vm11, %v364_v38, 0.0  ;;  %v4014_v49 = vsel %vm362_vm11, %v373_v39, 0.0 }
 0x11e   : > { %v3600_v45 = vpop.f32.mrf.mxu0  ;;  %v2151_v58 = vrot.slane %v4011_v48, 2  ;;  %v2166_v59 = vrot.slane %v4014_v49, 2 }
 0x11f   : > { %v4005_v46 = vsel %vm362_vm11, 0.0, %v363_v43  ;;  %v4008_v47 = vsel %vm362_vm11, 0.0, %v372_v44  ;;  %v367_v50 = vrot.slane %v3600_v45, 7  ;;  %v4024_v53 = vsel %vm362_vm11, %v363_v43, %v364_v38 }
 0x120   : > { %1050 = vrot.lane.b32.xlu1 %v4008_v47, %s3813_s15  ;;  %1038 = vrot.lane.b32.xlu0 %v4005_v46, %s3813_s15  ;;  %v325_v51 = vpop.f32.mrf.mxu0  ;;  %v4027_v55 = vsel %vm362_vm11, %v372_v44, %v373_v39  ;;  %v2163_v0 = vrot.slane %v4008_v47, 2  ;;  %v2148_v2 = vrot.slane %v4005_v46, 2  ;;  %v2149_v3 = vrot.slane %v4024_v53, 2 }
 0x121   : > { %v366_v54 = vrot.slane %v325_v51, 7  ;;  %v392_v56 = vsel %vm362_vm11, %v367_v50, 0.0  ;;  %v2164_v6 = vrot.slane %v4027_v55, 2  ;;  %v1278_v7 = vrot.slane %v4008_v47, 1 }
 0x122   : > { %v3603_v57 = vpop.f32.mrf.mxu0  ;;  %v2156_v4 = vrot.slane %v392_v56, 2  ;;  %v1271_v8 = vrot.slane %v392_v56, 1  ;;  %v4061_v16 = vsel %vm2147_vm12, %v2148_v2, %v2149_v3  ;;  %v4064_v17 = vsel %vm2147_vm12, %v2149_v3, %v2151_v58 }
 0x123   : > { %v4033_v60 = vsel %vm362_vm11, %v366_v54, %v367_v50  ;;  %v4036_v61 = vsel %vm362_vm11, 0.0, %v366_v54  ;;  %v370_v62 = vrot.slane %v3603_v57, 7  ;;  %v4101_v32 = vsel %vm2147_vm12, %v2163_v0, %v2164_v6 }
 0x124   : > { %610 = vrot.lane.b32.xlu1 %v4008_v47, %s3814_s17  ;;  %598 = vrot.lane.b32.xlu0 %v4005_v46, %s3814_s17  ;;  %v335_v63 = vpop.f32.mrf.mxu0  ;;  %v2153_v10 = vrot.slane %v4036_v61, 2  ;;  %v2154_v11 = vrot.slane %v4033_v60, 2  ;;  %v1269_v20 = vrot.slane %v4033_v60, 1  ;;  %v411_v27 = vcombine.low %v4036_v61, %v4008_v47 }
 0x125   : > { %v369_v5 = vrot.slane %v335_v63, 7  ;;  %v393_v9 = vsel %vm362_vm11, %v370_v62, 0.0  ;;  %v1263_v34 = vrot.slane %v4005_v46, 1  ;;  %v1264_v35 = vrot.slane %v4024_v53, 1 }
 0x126   : > { %v1276_v12 = vrot.slane %v393_v9, 1  ;;  %v2161_v13 = vrot.slane %v393_v9, 2  ;;  %v4072_v23 = vsel %vm2147_vm12, %v2154_v11, %v2156_v4  ;;  %v4085_v28 = vsel %vm2147_vm12, %v2153_v10, %v2154_v11 }
 0x127   : > { %v4051_v14 = vsel %vm362_vm11, %v369_v5, %v370_v62  ;;  %v4054_v15 = vsel %vm362_vm11, 0.0, %v369_v5  ;;  %v4091_v30 = vsel %vm1262_vm13, %v1269_v20, %v1271_v8  ;;  %v4106_v36 = vsel %vm2147_vm12, %v2164_v6, %v2166_v59 }
 0x128   : > { %830 = vrot.lane.b32.xlu1 %v4008_v47, %s3815_s25  ;;  %818 = vrot.lane.b32.xlu0 %v4005_v46, %s3815_s25  ;;  %v2158_v18 = vrot.slane %v4054_v15, 2  ;;  %v2159_v19 = vrot.slane %v4051_v14, 2  ;;  %v1273_v21 = vrot.slane %v4054_v15, 1  ;;  %v1274_v22 = vrot.slane %v4051_v14, 1 }
 0x129   : > { %v395_v26 = vcombine.low %v4005_v46, %v4054_v15  ;;  %v1268_v37 = vrot.slane %v4036_v61, 1  ;;  %v4113_v39 = vrot.slane %v411_v27, %v4021_v52  ;;  %v396_v40 = vcombine.high %v4005_v46, %v4054_v15 }
 0x12a   : > { %v4075_v24 = vsel %vm2147_vm12, %v2158_v18, %v2159_v19  ;;  %v4078_v25 = vsel %vm2147_vm12, %v2159_v19, %v2161_v13  ;;  %v4088_v29 = vsel %vm1262_vm13, %v1273_v21, %v1274_v22  ;;  %v4094_v31 = vsel %vm1262_vm13, %v1274_v22, %v1276_v12 }
 0x12b   : > { %v4110_v38 = vrot.slane %v395_v26, %v4021_v52  ;;  %6330 = vst [vmem:[#allocation12_spill] sm:$0xff] %v4113_v39  ;;  %v412_v41 = vcombine.high %v4036_v61, %v4008_v47  ;;  %v2177_v42 = vcombine.high %v4061_v16, %v4075_v24  ;;  %v2193_v43 = vcombine.high %v4085_v28, %v4101_v32 }
 0x12c   : > { %1052 = vrot.lane.b32.xlu1 %v4027_v55, %s3813_s15  ;;  %1040 = vrot.lane.b32.xlu0 %v4024_v53, %s3813_s15  ;;  %v2245_v44 = vcombine.high %v4064_v17, %v4078_v25  ;;  %v4128_v50 = vrot.slane %v396_v40, %v4021_v52  ;;  %v2261_v46 = vcombine.high %v4072_v23, %v4106_v36  ;;  %v1279_v54 = vrot.slane %v4027_v55, 1 }
 0x12d   : > { %6329 = vst [vmem:[#allocation11_spill] sm:$0xff] %v4110_v38  ;;  %v427_v45 = vcombine.low %v4110_v38, %v4113_v39  ;;  %v2176_v51 = vcombine.low %v4061_v16, %v4075_v24  ;;  %v4140_v56 = vrot.slane %v412_v41, %v4021_v52  ;;  %v4143_v57 = vrot.slane %v2177_v42, %v4021_v52 }
 0x12e   : > { %v4146_v58 = vrot.slane %v2193_v43, %v4021_v52  ;;  %v4149_v59 = vsel %vm1262_vm13, %v1263_v34, %v1264_v35  ;;  %v4152_v62 = vsel %vm1262_vm13, %v1268_v37, %v1269_v20  ;;  %v4155_v63 = vrot.slane %v2245_v44, %v4021_v52 }
 0x12f   : > { %v4158_v0 = vrot.slane %v2261_v46, %v4021_v52  ;;  %v444_v2 = vcombine.high %v4128_v50, %v4140_v56  ;;  %v443_v4 = vcombine.low %v4128_v50, %v4140_v56  ;;  %v2192_v5 = vcombine.low %v4085_v28, %v4101_v32 }
 0x130   : > { %612 = vrot.lane.b32.xlu1 %v4027_v55, %s3814_s17  ;;  %600 = vrot.lane.b32.xlu0 %v4024_v53, %s3814_s17  ;;  %v2225_v3 = vcombine.high %v4143_v57, %v4146_v58  ;;  %v4171_v8 = vrot.slane %v2176_v51, %v4021_v52  ;;  %v2244_v9 = vcombine.low %v4064_v17, %v4078_v25  ;;  %v1266_v11 = vrot.slane %v4011_v48, 1 }
 0x131   : > { %v2293_v6 = vcombine.high %v4155_v63, %v4158_v0  ;;  %v2260_v10 = vcombine.low %v4072_v23, %v4106_v36  ;;  %v1280_v12 = vsel %vm1262_vm13, %v1278_v7, %v1279_v54  ;;  %v4186_v13 = vrot.slane %v2192_v5, %v4021_v52 }
 0x132   : > { %v4189_v18 = vrot.slane %v2244_v9, %v4021_v52  ;;  %v1292_v48 = vcombine.high %v4149_v59, %v4088_v29  ;;  %v1308_v20 = vcombine.high %v4152_v62, %v1280_v12  ;;  %v2224_v7 = vcombine.low %v4143_v57, %v4146_v58 }
 0x133   : > { %v4192_v19 = vrot.slane %v2260_v10, %v4021_v52  ;;  %v2209_v21 = vcombine.high %v4171_v8, %v4186_v13  ;;  %v1291_v22 = vcombine.low %v4149_v59, %v4088_v29  ;;  %v1307_v34 = vcombine.low %v4152_v62, %v1280_v12 }
 0x134   : > { %832 = vrot.lane.b32.xlu1 %v4027_v55, %s3815_s25  ;;  %820 = vrot.lane.b32.xlu0 %v4024_v53, %s3815_s25  ;;  %v4210_v26 = vrot.slane %v1292_v48, %v4021_v52  ;;  %v4213_v27 = vrot.slane %v1308_v20, %v4021_v52  ;;  %v1267_v37 = vsel %vm1262_vm13, %v1264_v35, %v1266_v11  ;;  %v1281_v41 = vrot.slane %v4014_v49, 1 }
 0x135   : > { %v2277_v47 = vcombine.high %v4189_v18, %v4192_v19  ;;  %v4218_v40 = vrot.slane %v1291_v22, %v4021_v52  ;;  %v4224_v43 = vrot.slane %v1307_v34, %v4021_v52  ;;  %v2208_v44 = vcombine.low %v4171_v8, %v4186_v13 }
 0x136   : > { %v1340_v42 = vcombine.high %v4210_v26, %v4213_v27  ;;  %v1282_v49 = vsel %vm1262_vm13, %v1279_v54, %v1281_v41  ;;  %v1360_v35 = vcombine.high %v1267_v37, %v4094_v31  ;;  %v1359_v54 = vcombine.low %v1267_v37, %v4094_v31 }
 0x137   : > { %v1324_v51 = vcombine.high %v4218_v40, %v4224_v43  ;;  %v1376_v5 = vcombine.high %v4091_v30, %v1282_v49  ;;  %v1375_v48 = vcombine.low %v4091_v30, %v1282_v49 }
 0x138   : > { %2824 = vrot.lane.b32.xlu1 %v4101_v32, %s3813_s15  ;;  %2812 = vrot.lane.b32.xlu0 %v4061_v16, %s3813_s15  ;;  %v4254_v22 = vrot.slane %v1360_v35, %v4021_v52  ;;  %v4260_v41 = vrot.slane %v1359_v54, %v4021_v52  ;;  %v480_v35 = vcombine.high %v4033_v60, %v4027_v55 }
 0x139   : > { %v4257_v34 = vrot.slane %v1376_v5, %v4021_v52  ;;  %v4263_v11 = vrot.slane %v1375_v48, %v4021_v52  ;;  %v463_v5 = vcombine.low %v4024_v53, %v4051_v14 }
 0x13a   : > { %6331 = vst [vmem:[#allocation13_spill] sm:$0xff] %v4254_v22  ;;  %6333 = vst [vmem:[#allocation15_spill] sm:$0xff] %v4260_v41  ;;  %v4286_v20 = vrot.slane %v480_v35, %v4021_v52 }
 0x13b   : > { %6332 = vst [vmem:[#allocation14_spill] sm:$0xff] %v4257_v34  ;;  %6334 = vst [vmem:[#allocation16_spill] sm:$0xff] %v4263_v11  ;;  %v4289_v10 = vrot.slane %v463_v5, %v4021_v52 }
 0x13c   : > { %2384 = vrot.lane.b32.xlu1 %v4101_v32, %s3814_s17  ;;  %2372 = vrot.lane.b32.xlu0 %v4061_v16, %s3814_s17  ;;  %6336 = vst [vmem:[#allocation18_spill] sm:$0xff] %v4286_v20 }
 0x13d   : > { %6337 = vst [vmem:[#allocation19_spill] sm:$0xff] %v4289_v10 }
 0x140   : > { %2604 = vrot.lane.b32.xlu1 %v4101_v32, %s3815_s25  ;;  %2592 = vrot.lane.b32.xlu0 %v4061_v16, %s3815_s25  ;;  %v464_v32 = vcombine.high %v4024_v53, %v4051_v14  ;;  %v479_v53 = vcombine.low %v4033_v60, %v4027_v55 }
 0x142   : > { %v4283_v16 = vrot.slane %v464_v32, %v4021_v52  ;;  %v4301_v32 = vrot.slane %v479_v53, %v4021_v52 }
 0x144   : > { %1939 = vrot.lane.b32.xlu1 %v1280_v12, %s3813_s15  ;;  %1927 = vrot.lane.b32.xlu0 %v4149_v59, %s3813_s15  ;;  %6335 = vst [vmem:[#allocation17_spill] sm:$0xff] %v4283_v16  ;;  %6338 = vst [vmem:[#allocation20_spill] sm:$0xff] %v4301_v32 }
 0x148   : > { %1499 = vrot.lane.b32.xlu1 %v1280_v12, %s3814_s17  ;;  %1487 = vrot.lane.b32.xlu0 %v4149_v59, %s3814_s17 }
 0x14c   : > { %1719 = vrot.lane.b32.xlu1 %v1280_v12, %s3815_s25  ;;  %1707 = vrot.lane.b32.xlu0 %v4149_v59, %s3815_s25 }
 0x150   : > { %2826 = vrot.lane.b32.xlu1 %v4106_v36, %s3813_s15  ;;  %2814 = vrot.lane.b32.xlu0 %v4064_v17, %s3813_s15 }
 0x154   : > { %2386 = vrot.lane.b32.xlu1 %v4106_v36, %s3814_s17  ;;  %2374 = vrot.lane.b32.xlu0 %v4064_v17, %s3814_s17 }
 0x158   : > { %2606 = vrot.lane.b32.xlu1 %v4106_v36, %s3815_s25  ;;  %2594 = vrot.lane.b32.xlu0 %v4064_v17, %s3815_s25 }
 0x15c   : > { %1941 = vrot.lane.b32.xlu1 %v1282_v49, %s3813_s15  ;;  %1929 = vrot.lane.b32.xlu0 %v1267_v37, %s3813_s15 }
 0x160   : > { %1501 = vrot.lane.b32.xlu1 %v1282_v49, %s3814_s17  ;;  %1489 = vrot.lane.b32.xlu0 %v1267_v37, %s3814_s17 }
 0x164   : > { %1721 = vrot.lane.b32.xlu1 %v1282_v49, %s3815_s25  ;;  %1709 = vrot.lane.b32.xlu0 %v1267_v37, %s3815_s25 }
 0x168   : > { %1042 = vrot.lane.b32.xlu1 %v4036_v61, %s3813_s15  ;;  %2816 = vrot.lane.b32.xlu0 %v4085_v28, %s3813_s15 }
 0x16c   : > { %602 = vrot.lane.b32.xlu1 %v4036_v61, %s3814_s17  ;;  %1046 = vrot.lane.b32.xlu0 %v4054_v15, %s3813_s15 }
 0x170   : > { %822 = vrot.lane.b32.xlu1 %v4036_v61, %s3815_s25  ;;  %606 = vrot.lane.b32.xlu0 %v4054_v15, %s3814_s17 }
 0x174   : > { %1044 = vrot.lane.b32.xlu1 %v4033_v60, %s3813_s15  ;;  %826 = vrot.lane.b32.xlu0 %v4054_v15, %s3815_s25 }
 0x178   : > { %604 = vrot.lane.b32.xlu1 %v4033_v60, %s3814_s17  ;;  %1048 = vrot.lane.b32.xlu0 %v4051_v14, %s3813_s15 }
 0x17c   : > { %824 = vrot.lane.b32.xlu1 %v4033_v60, %s3815_s25  ;;  %608 = vrot.lane.b32.xlu0 %v4051_v14, %s3814_s17 }
 0x180   : > { %2376 = vrot.lane.b32.xlu1 %v4085_v28, %s3814_s17  ;;  %828 = vrot.lane.b32.xlu0 %v4051_v14, %s3815_s25 }
 0x184   : > { %2596 = vrot.lane.b32.xlu1 %v4085_v28, %s3815_s25  ;;  %2380 = vrot.lane.b32.xlu0 %v4075_v24, %s3814_s17 }
 0x188   : > { %1931 = vrot.lane.b32.xlu1 %v4152_v62, %s3813_s15  ;;  %2600 = vrot.lane.b32.xlu0 %v4075_v24, %s3815_s25 }
 0x18c   : > { %1491 = vrot.lane.b32.xlu1 %v4152_v62, %s3814_s17  ;;  %1935 = vrot.lane.b32.xlu0 %v4088_v29, %s3813_s15 }
 0x190   : > { %1711 = vrot.lane.b32.xlu1 %v4152_v62, %s3815_s25  ;;  %1495 = vrot.lane.b32.xlu0 %v4088_v29, %s3814_s17 }
 0x192   : > { %v4372_v60 = vpop.permute.xlu1 %1050  ;;  %v4374_v61 = vpop.permute.xlu0 %1038 }
 0x194   : > { %2818 = vrot.lane.b32.xlu1 %v4072_v23, %s3813_s15  ;;  %1715 = vrot.lane.b32.xlu0 %v4088_v29, %s3815_s25  ;;  %v3816_v29 = vmov 1934713408  }
 0x195   : > { %v430_v36 = vunpack.c.l.s4 %v3816_v29 }
 0x196   : > { %v4380_v14 = vpop.permute.xlu1 %610  ;;  %v4382_v15 = vpop.permute.xlu0 %598 }
 0x197   : > { %v431_v12 = vunpack.c.0.s8 %v430_v36 }
 0x198   : > { %2378 = vrot.lane.b32.xlu1 %v4072_v23, %s3814_s17  ;;  %2822 = vrot.lane.b32.xlu0 %v4078_v25, %s3813_s15 }
 0x19a   : > { %v4388_v17 = vpop.permute.xlu1 %830  ;;  %v4390_v28 = vpop.permute.xlu0 %818 }
 0x19c   : > { %2598 = vrot.lane.b32.xlu1 %v4072_v23, %s3815_s25  ;;  %2382 = vrot.lane.b32.xlu0 %v4078_v25, %s3814_s17  ;;  %v4413_v23 = vsub.s32 %v431_v12, %v3974_v1 }
 0x19e   : > { %v4396_v59 = vpop.permute.xlu1 %1052  ;;  %v4398_v62 = vpop.permute.xlu0 %1040  ;;  %v4431_v1 = vrot.slane %v427_v45, %v4413_v23  ;;  %v4447_v55 = vrot.slane %v444_v2, %v4413_v23  ;;  %v2239_v2 = vrot.slane %v2225_v3, %v4413_v23  ;;  %v2223_v3 = vrot.slane %v2209_v21, %v4413_v23 }
 0x19f   : > { %6339 = vst [vmem:[#allocation21_spill] sm:$0xff] %v4396_v59  ;;  %6340 = vst [vmem:[#allocation22_spill] sm:$0xff] %v4398_v62  ;;  %v4492_v35 = vrot.slane %v2277_v47, %v4413_v23  ;;  %v4502_v21 = vrot.slane %v2224_v7, %v4413_v23  ;;  %v4521_v57 = vrot.slane %v2208_v44, %v4413_v23 }
 0x1a0   : > { %1933 = vrot.lane.b32.xlu1 %v4091_v30, %s3813_s15  ;;  %2602 = vrot.lane.b32.xlu0 %v4078_v25, %s3815_s25  ;;  %6345 = vst [vmem:[#allocation27_spill] sm:$0xff] %v4431_v1  ;;  %v459_v12 = vcombine.high %v4431_v1, %v6244_v33  ;;  %6346 = vst [vmem:[#allocation28_spill] sm:$0xff] %v4447_v55  ;;  %v2243_v9 = vcombine.high %v2239_v2, %v6244_v33 }
 0x1a1   : > { %6348 = vst [vmem:[#allocation30_spill] sm:$0xff] %v4492_v35  ;;  %6349 = vst [vmem:[#allocation31_spill] sm:$0xff] %v4502_v21  ;;  %v2242_v54 = vcombine.high %v4502_v21, %v6244_v33  ;;  %v2240_v1 = vcombine.high %v4521_v57, %v6244_v33 }
 0x1a2   : > { %v4404_v37 = vpop.permute.xlu1 %612  ;;  %v4406_v49 = vpop.permute.xlu0 %600  ;;  %6350 = vst [vmem:[#allocation32_spill] sm:$0xff] %v4521_v57 }
 0x1a3   : > { %6341 = vst [vmem:[#allocation23_spill] sm:$0xff] %v4404_v37  ;;  %6342 = vst [vmem:[#allocation24_spill] sm:$0xff] %v4406_v49 }
 0x1a4   : > { %1493 = vrot.lane.b32.xlu1 %v4091_v30, %s3814_s17  ;;  %1937 = vrot.lane.b32.xlu0 %v4094_v31, %s3813_s15 }
 0x1a6   : > { %v4415_v5 = vpop.permute.xlu1 %832  ;;  %v4417_v53 = vpop.permute.xlu0 %820 }
 0x1a7   : > { %6343 = vst [vmem:[#allocation25_spill] sm:$0xff] %v4415_v5  ;;  %6344 = vst [vmem:[#allocation26_spill] sm:$0xff] %v4417_v53 }
 0x1a8   : > { %1713 = vrot.lane.b32.xlu1 %v4091_v30, %s3815_s25  ;;  %1497 = vrot.lane.b32.xlu0 %v4094_v31, %s3814_s17 }
 0x1aa   : > { %v4423_v25 = vpop.permute.xlu1 %2824  ;;  %v4425_v29 = vpop.permute.xlu0 %2812 }
 0x1ac   : > { %2820 = vrot.lane.b32.xlu1 %v4075_v24, %s3813_s15  ;;  %1717 = vrot.lane.b32.xlu0 %v4094_v31, %s3815_s25  ;;  %v4453_v24 = vrot.slane %v443_v4, %v4413_v23 }
 0x1ae   : > { %v4437_v30 = vpop.permute.xlu1 %2384  ;;  %v4439_v36 = vpop.permute.xlu0 %2372  ;;  %6347 = vst [vmem:[#allocation29_spill] sm:$0xff] %v4453_v24  ;;  %v461_v50 = vcombine.high %v4453_v24, %v6244_v33  ;;  %v6355_v24 = vcombine.low %v4189_v18, %v4192_v19 }
 0x1b0   : > { %532 = vrot.lane.b32.xlu1 %v459_v12, %s3817_s26  ;;  %548 = vrot.lane.b32.xlu0 %v4447_v55, %s3818_s8  ;;  %v2307_v12 = vrot.slane %v2293_v6, %v4413_v23  ;;  %v1354_v6 = vrot.slane %v1340_v42, %v4413_v23  ;;  %v1338_v42 = vrot.slane %v1324_v51, %v4413_v23 }
 0x1b1   : > { %v6351_v51 = vcombine.low %v4218_v40, %v4224_v43  ;;  %v6353_v40 = vcombine.low %v4210_v26, %v4213_v27  ;;  %v4566_v26 = vrot.slane %v6355_v24, %v4413_v23  ;;  %v6357_v27 = vcombine.low %v4155_v63, %v4158_v0 }
 0x1b2   : > { %v4458_v31 = vpop.permute.xlu1 %2604  ;;  %v4460_v45 = vpop.permute.xlu0 %2592  ;;  %v2311_v19 = vcombine.high %v2307_v12, %v6244_v33  ;;  %v1356_v24 = vcombine.high %v1338_v42, %v6244_v33 }
 0x1b3   : > { %v4536_v8 = vrot.slane %v6351_v51, %v4413_v23  ;;  %v4551_v43 = vrot.slane %v6353_v40, %v4413_v23  ;;  %v1358_v51 = vcombine.high %v1354_v6, %v6244_v33  ;;  %6356 = vst [vmem:[#allocation35_spill] sm:$0xff] %v4566_v26 }
 0x1b4   : > { %2329 = vrot.lane.b32.xlu1 %v2239_v2, %s3818_s8  ;;  %544 = vrot.lane.b32.xlu0 %v461_v50, %s3817_s26 }
 0x1b5   : > { %6352 = vst [vmem:[#allocation33_spill] sm:$0xff] %v4536_v8  ;;  %v1355_v2 = vcombine.high %v4536_v8, %v6244_v33  ;;  %6354 = vst [vmem:[#allocation34_spill] sm:$0xff] %v4551_v43 }
 0x1b6   : > { %v4470_v56 = vpop.permute.xlu1 %1939  ;;  %v4472_v4 = vpop.permute.xlu0 %1927 }
 0x1b8   : > { %2353 = vrot.lane.b32.xlu1 %v2307_v12, %s3818_s8  ;;  %2317 = vrot.lane.b32.xlu0 %v2223_v3, %s3818_s8 }
 0x1ba   : > { %v4484_v48 = vpop.permute.xlu1 %1499  ;;  %v4486_v50 = vpop.permute.xlu0 %1487 }
 0x1bc   : > { %2341 = vrot.lane.b32.xlu1 %v4492_v35, %s3818_s8  ;;  %1444 = vrot.lane.b32.xlu0 %v1354_v6, %s3818_s8  ;;  %v2308_v6 = vcombine.high %v4566_v26, %v6244_v33 }
 0x1be   : > { %v4507_v46 = vpop.permute.xlu1 %1719  ;;  %v4509_v47 = vpop.permute.xlu0 %1707 }
 0x1c0   : > { %2325 = vrot.lane.b32.xlu1 %v2242_v54, %s3817_s26  ;;  %1432 = vrot.lane.b32.xlu0 %v1338_v42, %s3818_s8  ;;  %v2241_v54 = vcombine.high %v2223_v3, %v6244_v33  ;;  %v1357_v3 = vcombine.high %v4551_v43, %v6244_v33 }
 0x1c2   : > { %v4525_v58 = vpop.permute.xlu1 %2826  ;;  %v4527_v7 = vpop.permute.xlu0 %2814 }
 0x1c4   : > { %2333 = vrot.lane.b32.xlu1 %v2243_v9, %s3819_s18  ;;  %2313 = vrot.lane.b32.xlu0 %v2240_v1, %s3817_s26 }
 0x1c6   : > { %v4540_v13 = vpop.permute.xlu1 %2386  ;;  %v4542_v44 = vpop.permute.xlu0 %2374 }
 0x1c8   : > { %2321 = vrot.lane.b32.xlu0 %v2241_v54, %s3819_s18  ;;  %1428 = vrot.lane.b32.xlu1 %v1355_v2, %s3817_s26  ;;  %v4572_v54 = vrot.slane %v6357_v27, %v4413_v23 }
 0x1ca   : > { %v4555_v9 = vpop.permute.xlu1 %2606  ;;  %v4557_v1 = vpop.permute.xlu0 %2594  ;;  %6358 = vst [vmem:[#allocation36_spill] sm:$0xff] %v4572_v54  ;;  %v2310_v18 = vcombine.high %v4572_v54, %v6244_v33 }
 0x1cc   : > { %1440 = vrot.lane.b32.xlu0 %v1357_v3, %s3817_s26  ;;  %1448 = vrot.lane.b32.xlu1 %v1358_v51, %s3819_s18 }
 0x1ce   : > { %v4576_v2 = vpop.permute.xlu1 %1941  ;;  %v4578_v40 = vpop.permute.xlu0 %1929 }
 0x1d0   : > { %2337 = vrot.lane.b32.xlu0 %v2308_v6, %s3817_s26  ;;  %2349 = vrot.lane.b32.xlu1 %v2310_v18, %s3817_s26 }
 0x1d2   : > { %v4586_v63 = vpop.permute.xlu1 %1501  ;;  %v4588_v0 = vpop.permute.xlu0 %1489 }
 0x1d4   : > { %2357 = vrot.lane.b32.xlu0 %v2311_v19, %s3819_s18  ;;  %1436 = vrot.lane.b32.xlu1 %v1356_v24, %s3819_s18 }
 0x1d6   : > { %v4594_v3 = vpop.permute.xlu1 %1721  ;;  %v4596_v51 = vpop.permute.xlu0 %1709 }
 0x1d7   : > { %6359 = vst [vmem:[#allocation37_spill] sm:$0xff] %v4594_v3  ;;  %6360 = vst [vmem:[#allocation38_spill] sm:$0xff] %v4596_v51 }
 0x1da   : > { %v1043_v27 = vpop.permute.xlu1 %1042  ;;  %v4598_v6 = vpop.permute.xlu0 %2816 }
 0x1db   : > { %v1079_v18 = vcombine.high %v1043_v27, %v4372_v60  ;;  %v1078_v42 = vcombine.low %v1043_v27, %v4372_v60 }
 0x1dd   : > { %v4608_v24 = vrot.slane %v1079_v18, %v4021_v52  ;;  %v4615_v10 = vrot.slane %v1078_v42, %v4021_v52 }
 0x1de   : > { %v603_v26 = vpop.permute.xlu1 %602  ;;  %v1047_v54 = vpop.permute.xlu0 %1046 }
 0x1df   : > { %v1062_v8 = vcombine.low %v4374_v61, %v1047_v54  ;;  %v1063_v12 = vcombine.high %v4374_v61, %v1047_v54  ;;  %v639_v33 = vcombine.high %v603_v26, %v4380_v14  ;;  %v638_v27 = vcombine.low %v603_v26, %v4380_v14 }
 0x1e1   : > { %v4605_v19 = vrot.slane %v1063_v12, %v4021_v52  ;;  %v4612_v43 = vrot.slane %v1062_v8, %v4021_v52  ;;  %v653_v18 = vrot.slane %v639_v33, %v4021_v52  ;;  %v646_v26 = vrot.slane %v638_v27, %v4021_v52 }
 0x1e2   : > { %v823_v57 = vpop.permute.xlu1 %822  ;;  %v607_v32 = vpop.permute.xlu0 %606 }
 0x1e3   : > { %v622_v61 = vcombine.low %v4382_v15, %v607_v32  ;;  %v623_v60 = vcombine.high %v4382_v15, %v607_v32  ;;  %v1111_v54 = vcombine.high %v4605_v19, %v4608_v24  ;;  %v1095_v42 = vcombine.high %v4612_v43, %v4615_v10 }
 0x1e4   : > { %v859_v14 = vcombine.high %v823_v57, %v4388_v17 }
 0x1e5   : > { %v637_v12 = vrot.slane %v623_v60, %v4021_v52  ;;  %v4627_v16 = vrot.slane %v1111_v54, %v4413_v23  ;;  %v630_v32 = vrot.slane %v622_v61, %v4021_v52  ;;  %v858_v60 = vcombine.low %v823_v57, %v4388_v17 }
 0x1e6   : > { %v4624_v8 = vpop.permute.xlu1 %1044  ;;  %v827_v20 = vpop.permute.xlu0 %826  ;;  %v1109_v61 = vrot.slane %v1095_v42, %v4413_v23  ;;  %v873_v53 = vrot.slane %v859_v14, %v4021_v52 }
 0x1e7   : > { %6361 = vst [vmem:[#allocation39_spill] sm:$0xff] %v4624_v8  ;;  %v842_v15 = vcombine.low %v4390_v28, %v827_v20  ;;  %v843_v21 = vcombine.high %v4390_v28, %v827_v20  ;;  %v670_v33 = vcombine.low %v637_v12, %v653_v18  ;;  %1215 = vrot.lane.b32.xlu0 %v4627_v16, %s3818_s8 }
 0x1e8   : > { %v671_v5 = vcombine.high %v637_v12, %v653_v18  ;;  %v654_v28 = vcombine.low %v630_v32, %v646_v26  ;;  %v6367_v18 = vmov 0.0  }
 0x1e9   : > { %v857_v54 = vrot.slane %v843_v21, %v4021_v52  ;;  %v4646_v20 = vrot.slane %v670_v33, %v4413_v23  ;;  %v850_v37 = vrot.slane %v842_v15, %v4021_v52  ;;  %v866_v21 = vrot.slane %v858_v60, %v4021_v52 }
 0x1ea   : > { %v4640_v11 = vpop.permute.xlu1 %604  ;;  %v4642_v41 = vpop.permute.xlu0 %1048  ;;  %v685_v17 = vrot.slane %v671_v5, %v4413_v23  ;;  %v4661_v15 = vrot.slane %v654_v28, %v4413_v23  ;;  %v1110_v28 = vcombine.low %v4605_v19, %v4608_v24  ;;  %v1127_v24 = vcombine.high %v1109_v61, %v6367_v18 }
 0x1eb   : > { %6362 = vst [vmem:[#allocation40_spill] sm:$0xff] %v4640_v11  ;;  %6363 = vst [vmem:[#allocation41_spill] sm:$0xff] %v4642_v41  ;;  %1203 = vrot.lane.b32.xlu0 %v1109_v61, %s3818_s8  ;;  %v688_v12 = vcombine.high %v4646_v20, %v6367_v18  ;;  %v891_v42 = vcombine.high %v857_v54, %v873_v53  ;;  %v874_v33 = vcombine.low %v850_v37, %v866_v21 }
 0x1ec   : > { %6364 = vst [vmem:[#allocation42_spill] sm:$0xff] %v4646_v20  ;;  %775 = vrot.lane.b32.xlu1 %v685_v17, %s3818_s8  ;;  %6368 = vst [vmem:[#allocation45_spill] sm:$0xff] %v4661_v15  ;;  %v655_v11 = vcombine.high %v630_v32, %v646_v26  ;;  %v1094_v26 = vcombine.low %v4612_v43, %v4615_v10  ;;  %v689_v61 = vcombine.high %v685_v17, %v6367_v18 }
 0x1ed   : > { %v905_v5 = vrot.slane %v891_v42, %v4413_v23  ;;  %v4672_v49 = vrot.slane %v874_v33, %v4413_v23 }
 0x1ee   : > { %v4654_v57 = vpop.permute.xlu1 %824  ;;  %v4656_v27 = vpop.permute.xlu0 %608  ;;  %v669_v42 = vrot.slane %v655_v11, %v4413_v23  ;;  %v4695_v11 = vrot.slane %v1110_v28, %v4413_v23  ;;  %v4709_v28 = vrot.slane %v1094_v26, %v4413_v23 }
 0x1ef   : > { %6365 = vst [vmem:[#allocation43_spill] sm:$0xff] %v4654_v57  ;;  %6366 = vst [vmem:[#allocation44_spill] sm:$0xff] %v4656_v27  ;;  %771 = vrot.lane.b32.xlu0 %v688_v12, %s3817_s26  ;;  %v686_v57 = vcombine.high %v4661_v15, %v6367_v18  ;;  %v875_v12 = vcombine.high %v850_v37, %v866_v21  ;;  %v906_v32 = vcombine.high %v4672_v49, %v6367_v18 }
 0x1f0   : > { %6370 = vst [vmem:[#allocation47_spill] sm:$0xff] %v4672_v49  ;;  %995 = vrot.lane.b32.xlu1 %v905_v5, %s3818_s8  ;;  %6371 = vst [vmem:[#allocation48_spill] sm:$0xff] %v4695_v11  ;;  %v890_v21 = vcombine.low %v857_v54, %v873_v53  ;;  %v1128_v10 = vcombine.high %v4695_v11, %v6367_v18 }
 0x1f1   : > { %6372 = vst [vmem:[#allocation49_spill] sm:$0xff] %v4709_v28 }
 0x1f2   : > { %v4665_v14 = vpop.permute.xlu1 %2376  ;;  %v4667_v60 = vpop.permute.xlu0 %828  ;;  %v4729_v17 = vrot.slane %v890_v21, %v4413_v23 }
 0x1f3   : > { %6369 = vst [vmem:[#allocation46_spill] sm:$0xff] %v4667_v60  ;;  %759 = vrot.lane.b32.xlu0 %v686_v57, %s3817_s26  ;;  %v889_v57 = vrot.slane %v875_v12, %v4413_v23  ;;  %v2413_v38 = vcombine.high %v4665_v14, %v4437_v30 }
 0x1f4   : > { %763 = vrot.lane.b32.xlu1 %v669_v42, %s3818_s8  ;;  %6375 = vst [vmem:[#allocation52_spill] sm:$0xff] %v4729_v17 }
 0x1f6   : > { %v4679_v20 = vpop.permute.xlu1 %2596  ;;  %v4681_v60 = vpop.permute.xlu0 %2380 }
 0x1f7   : > { %979 = vrot.lane.b32.xlu0 %v906_v32, %s3817_s26 }
 0x1f8   : > { %983 = vrot.lane.b32.xlu1 %v889_v57, %s3818_s8 }
 0x1fa   : > { %v4690_v19 = vpop.permute.xlu1 %1931  ;;  %v4692_v37 = vpop.permute.xlu0 %2600 }
 0x1fb   : > { %1207 = vrot.lane.b32.xlu0 %v1127_v24, %s3819_s18  ;;  %v1968_v33 = vcombine.high %v4690_v19, %v4470_v56  ;;  %v1126_v24 = vcombine.high %v4709_v28, %v6367_v18  ;;  %v907_v28 = vcombine.high %v889_v57, %v6367_v18  ;;  %v2617_v62 = vcombine.high %v4460_v45, %v4692_v37 }
 0x1fc   : > { %1211 = vrot.lane.b32.xlu1 %v1128_v10, %s3817_s26  ;;  %v909_v10 = vcombine.high %v905_v5, %v6367_v18  ;;  %v1129_v5 = vcombine.high %v4627_v16, %v6367_v18 }
 0x1fd   : > { %v4717_v54 = vrot.slane %v1968_v33, %v4021_v52  ;;  %v908_v33 = vcombine.high %v4729_v17, %v6367_v18 }
 0x1fe   : > { %v4704_v43 = vpop.permute.xlu1 %1491  ;;  %v4706_v12 = vpop.permute.xlu0 %1935 }
 0x1ff   : > { %v1952_v53 = vcombine.high %v4472_v4, %v4706_v12  ;;  %779 = vrot.lane.b32.xlu0 %v689_v61, %s3819_s18  ;;  %6373 = vst [vmem:[#allocation50_spill] sm:$0xff] %v4717_v54 }
 0x200   : > { %1199 = vrot.lane.b32.xlu1 %v1126_v24, %s3817_s26 }
 0x201   : > { %v4720_v32 = vrot.slane %v1952_v53, %v4021_v52 }
 0x202   : > { %v4724_v26 = vpop.permute.xlu1 %1711  ;;  %v4726_v15 = vpop.permute.xlu0 %1495 }
 0x203   : > { %6374 = vst [vmem:[#allocation51_spill] sm:$0xff] %v4720_v32  ;;  %999 = vrot.lane.b32.xlu0 %v909_v10, %s3819_s18  ;;  %v687_v10 = vcombine.high %v669_v42, %v6367_v18  ;;  %v1511_v41 = vcombine.low %v4486_v50, %v4726_v15 }
 0x204   : > { %991 = vrot.lane.b32.xlu1 %v908_v33, %s3817_s26 }
 0x206   : > { %v4738_v53 = vpop.permute.xlu1 %2818  ;;  %v4740_v49 = vpop.permute.xlu0 %1715 }
 0x207   : > { %987 = vrot.lane.b32.xlu0 %v907_v28, %s3819_s18 }
 0x208   : > { %1219 = vrot.lane.b32.xlu1 %v1129_v5, %s3819_s18 }
 0x20a   : > { %v4747_v21 = vpop.permute.xlu1 %2378  ;;  %v4749_v24 = vpop.permute.xlu0 %2822 }
 0x20c   : > { %767 = vrot.lane.b32.xlu1 %v687_v10, %s3819_s18 }
 0x20e   : > { %v4753_v61 = vpop.permute.xlu1 %2598  ;;  %v4755_v17 = vpop.permute.xlu0 %2382 }
 0x212   : > { %v1934_v57 = vpop.permute.xlu1 %1933  ;;  %v4758_v33 = vpop.permute.xlu0 %2602 }
 0x213   : > { %v2035_v28 = vcombine.low %v1934_v57, %v4576_v2  ;;  %v2036_v16 = vcombine.high %v1934_v57, %v4576_v2 }
 0x215   : > { %v4767_v34 = vrot.slane %v2035_v28, %v4021_v52  ;;  %v4770_v22 = vrot.slane %v2036_v16, %v4021_v52  ;;  %v2853_v28 = vcombine.high %v4598_v6, %v4423_v25  ;;  %v2397_v16 = vcombine.high %v4439_v36, %v4681_v60 }
 0x216   : > { %v4762_v11 = vpop.permute.xlu1 %1493  ;;  %v1938_v27 = vpop.permute.xlu0 %1937 }
 0x217   : > { %v2019_v5 = vcombine.low %v4578_v40, %v1938_v27  ;;  %v2020_v42 = vcombine.high %v4578_v40, %v1938_v27  ;;  %v2852_v27 = vcombine.low %v4598_v6, %v4423_v25  ;;  %v4806_v6 = vrot.slane %v2853_v28, %v4021_v52 }
 0x218   : > { %v4809_v59 = vrot.slane %v2397_v16, %v4021_v52  ;;  %v4825_v28 = vrot.slane %v2413_v38, %v4021_v52  ;;  %v2633_v16 = vcombine.high %v4679_v20, %v4458_v31 }
 0x219   : > { %v4773_v10 = vrot.slane %v2019_v5, %v4021_v52  ;;  %v4776_v55 = vrot.slane %v2020_v42, %v4021_v52  ;;  %v4803_v25 = vrot.slane %v2852_v27, %v4021_v52  ;;  %6378 = vst [vmem:[#allocation55_spill] sm:$0xff] %v4806_v6 }
 0x21a   : > { %v4778_v2 = vpop.permute.xlu1 %1713  ;;  %v4780_v57 = vpop.permute.xlu0 %1497  ;;  %v2445_v38 = vcombine.high %v4809_v59, %v4825_v28 }
 0x21b   : > { %6376 = vst [vmem:[#allocation53_spill] sm:$0xff] %v4778_v2  ;;  %v1816_v39 = vcombine.high %v4778_v2, %v4594_v3  ;;  %v2396_v3 = vcombine.low %v4439_v36, %v4681_v60  ;;  %v4850_v60 = vrot.slane %v1511_v41, %v4021_v52  ;;  %v1747_v41 = vcombine.low %v4724_v26, %v4507_v46 }
 0x21d   : > { %v4830_v2 = vrot.slane %v1816_v39, %v4021_v52  ;;  %v2000_v39 = vcombine.high %v4720_v32, %v4717_v54  ;;  %6380 = vst [vmem:[#allocation57_spill] sm:$0xff] %v4850_v60  ;;  %v4863_v54 = vrot.slane %v2633_v16, %v4021_v52  ;;  %v4882_v16 = vrot.slane %v2445_v38, %v4413_v23 }
 0x21e   : > { %v2821_v5 = vpop.permute.xlu1 %2820  ;;  %v4792_v42 = vpop.permute.xlu0 %1717  ;;  %v2904_v32 = vcombine.low %v4527_v7, %v4749_v24  ;;  %v4900_v38 = vrot.slane %v1747_v41, %v4021_v52 }
 0x21f   : > { %6377 = vst [vmem:[#allocation54_spill] sm:$0xff] %v4792_v42  ;;  %v2836_v40 = vcombine.low %v4425_v29, %v2821_v5  ;;  %v2837_v35 = vcombine.high %v4425_v29, %v2821_v5  ;;  %v1800_v8 = vcombine.high %v4596_v51, %v4792_v42  ;;  %v4843_v51 = vrot.slane %v2617_v62, %v4021_v52 }
 0x220   : > { %v1731_v42 = vcombine.low %v4509_v47, %v4740_v49  ;;  %v2412_v62 = vcombine.low %v4665_v14, %v4437_v30  ;;  %v2616_v30 = vcombine.low %v4460_v45, %v4692_v37  ;;  %v2632_v37 = vcombine.low %v4679_v20, %v4458_v31 }
 0x221   : > { %v4816_v29 = vrot.slane %v2836_v40, %v4021_v52  ;;  %v4819_v5 = vrot.slane %v2837_v35, %v4021_v52  ;;  %v4822_v27 = vrot.slane %v1800_v8, %v4021_v52  ;;  %v1527_v40 = vcombine.low %v4704_v43, %v4484_v48 }
 0x222   : > { %v2665_v14 = vcombine.high %v4843_v51, %v4863_v54  ;;  %v4895_v45 = vrot.slane %v2412_v62, %v4021_v52  ;;  %v4915_v31 = vrot.slane %v2616_v30, %v4021_v52  ;;  %v1951_v20 = vcombine.low %v4472_v4, %v4706_v12 }
 0x223   : > { %6379 = vst [vmem:[#allocation56_spill] sm:$0xff] %v4819_v5  ;;  %v2869_v35 = vcombine.high %v4816_v29, %v4803_v25  ;;  %v2885_v8 = vcombine.high %v4819_v5, %v4806_v6  ;;  %v4866_v36 = vrot.slane %v1527_v40, %v4021_v52  ;;  %v4922_v41 = vrot.slane %v2904_v32, %v4021_v52 }
 0x224   : > { %v4933_v30 = vrot.slane %v2632_v37, %v4021_v52  ;;  %v4943_v12 = vrot.slane %v1951_v20, %v4021_v52  ;;  %v1512_v32 = vcombine.high %v4486_v50, %v4726_v15  ;;  %v1528_v50 = vcombine.high %v4704_v43, %v4484_v48 }
 0x225   : > { %v4855_v5 = vrot.slane %v2885_v8, %v4413_v23  ;;  %v4858_v6 = vrot.slane %v2869_v35, %v4413_v23  ;;  %v4875_v35 = vrot.slane %v2396_v3, %v4021_v52  ;;  %v1544_v40 = vcombine.high %v4850_v60, %v4866_v36  ;;  %v4906_v60 = vpop.permute.xlu0 %548 }
 0x226   : > { %v4887_v8 = vrot.slane %v1731_v42, %v4021_v52  ;;  %v4892_v3 = vrot.slane %v2000_v39, %v4413_v23  ;;  %v4904_v42 = vpop.permute.xlu1 %532  ;;  %6384 = vst [vmem:[#allocation61_spill] sm:$0xff] %v4906_v60 }
 0x227   : > { %6381 = vst [vmem:[#allocation58_spill] sm:$0xff] %v4855_v5  ;;  %2989 = vrot.lane.b32.xlu0 %v4855_v5, %s3818_s8  ;;  %2977 = vrot.lane.b32.xlu1 %v4858_v6, %s3818_s8  ;;  %v2920_v5 = vcombine.low %v4738_v53, %v4525_v58  ;;  %6383 = vst [vmem:[#allocation60_spill] sm:$0xff] %v4904_v42  ;;  %v2429_v39 = vcombine.high %v4875_v35, %v4895_v45 }
 0x228   : > { %6382 = vst [vmem:[#allocation59_spill] sm:$0xff] %v4892_v3  ;;  %v1764_v62 = vcombine.high %v4887_v8, %v4900_v38  ;;  %v4925_v42 = vrot.slane %v2665_v14, %v4413_v23  ;;  %v4928_v60 = vrot.slane %v1544_v40, %v4413_v23 }
 0x229   : > { %v4936_v4 = vrot.slane %v2920_v5, %v4021_v52  ;;  %v4953_v14 = vpop.permute.xlu0 %544  ;;  %v4956_v40 = vrot.slane %v2429_v39, %v4413_v23  ;;  %v4973_v39 = vrot.slane %v1512_v32, %v4021_v52 }
 0x22a   : > { %v4951_v5 = vpop.permute.xlu1 %2329  ;;  %6386 = vst [vmem:[#allocation63_spill] sm:$0xff] %v4953_v14  ;;  %v4959_v37 = vrot.slane %v1764_v62, %v4413_v23  ;;  %v1732_v62 = vcombine.high %v4509_v47, %v4740_v49  ;;  %v4986_v14 = vrot.slane %v1528_v50, %v4021_v52 }
 0x22b   : > { %2549 = vrot.lane.b32.xlu0 %v4882_v16, %s3818_s8  ;;  %2104 = vrot.lane.b32.xlu1 %v4892_v3, %s3818_s8  ;;  %v1967_v3 = vcombine.low %v4690_v19, %v4470_v56  ;;  %v2649_v56 = vcombine.high %v4915_v31, %v4933_v30  ;;  %v2937_v19 = vcombine.high %v4922_v41, %v4936_v4 }
 0x22c   : > { %6385 = vst [vmem:[#allocation62_spill] sm:$0xff] %v4951_v5  ;;  %6387 = vst [vmem:[#allocation64_spill] sm:$0xff] %v4959_v37  ;;  %v1748_v5 = vcombine.high %v4724_v26, %v4507_v46  ;;  %v1560_v49 = vcombine.high %v4973_v39, %v4986_v14  ;;  %v5001_v47 = vrot.slane %v1732_v62, %v4021_v52 }
 0x22d   : > { %v4962_v20 = vrot.slane %v1967_v3, %v4021_v52  ;;  %v2068_v3 = vcombine.high %v4776_v55, %v4770_v22  ;;  %v4980_v48 = vrot.slane %v2649_v56, %v4413_v23  ;;  %v4983_v43 = vrot.slane %v2937_v19, %v4413_v23 }
 0x22e   : > { %v4990_v32 = vpop.permute.xlu1 %2353  ;;  %v2905_v46 = vcombine.high %v4527_v7, %v4749_v24  ;;  %v2052_v26 = vcombine.high %v4773_v10, %v4767_v34  ;;  %v2868_v19 = vcombine.low %v4816_v29, %v4803_v25  ;;  %v2921_v62 = vcombine.high %v4738_v53, %v4525_v58 }
 0x22f   : > { %2769 = vrot.lane.b32.xlu0 %v4925_v42, %s3818_s8  ;;  %1652 = vrot.lane.b32.xlu1 %v4928_v60, %s3818_s8  ;;  %v1984_v15 = vcombine.high %v4943_v12, %v4962_v20  ;;  %6388 = vst [vmem:[#allocation65_spill] sm:$0xff] %v4990_v32  ;;  %v5013_v50 = vrot.slane %v2068_v3, %v4413_v23 }
 0x230   : > { %v5016_v32 = vrot.slane %v1748_v5, %v4021_v52  ;;  %v2444_v7 = vcombine.low %v4809_v59, %v4825_v28  ;;  %v5029_v25 = vrot.slane %v1560_v49, %v4413_v23  ;;  %v5032_v29 = vrot.slane %v2905_v46, %v4021_v52 }
 0x231   : > { %v5004_v56 = vrot.slane %v1984_v15, %v4413_v23  ;;  %v2465_v58 = vcombine.high %v4542_v44, %v4755_v17  ;;  %v5041_v15 = vrot.slane %v2052_v26, %v4413_v23  ;;  %v5044_v59 = vrot.slane %v2868_v19, %v4413_v23 }
 0x232   : > { %v1780_v24 = vcombine.high %v5001_v47, %v5016_v32  ;;  %v5036_v53 = vpop.permute.xlu1 %2341  ;;  %v5047_v28 = vrot.slane %v2921_v62, %v4021_v52  ;;  %v2481_v3 = vcombine.high %v4747_v21, %v4540_v13  ;;  %v2428_v49 = vcombine.low %v4875_v35, %v4895_v45 }
 0x233   : > { %2537 = vrot.lane.b32.xlu0 %v4956_v40, %s3818_s8  ;;  %1872 = vrot.lane.b32.xlu1 %v4959_v37, %s3818_s8  ;;  %v4992_v37 = vpop.permute.xlu0 %2317  ;;  %6390 = vst [vmem:[#allocation67_spill] sm:$0xff] %v5036_v53  ;;  %6392 = vst [vmem:[#allocation69_spill] sm:$0xff] %v5044_v59  ;;  %v5061_v26 = vrot.slane %v2444_v7, %v4413_v23  ;;  %v5066_v62 = vrot.slane %v2465_v58, %v4021_v52 }
 0x234   : > { %6389 = vst [vmem:[#allocation66_spill] sm:$0xff] %v4992_v37  ;;  %v5058_v46 = vrot.slane %v1780_v24, %v4413_v23  ;;  %v2953_v19 = vcombine.high %v5032_v29, %v5047_v28  ;;  %v2685_v53 = vcombine.high %v4557_v1, %v4758_v33  ;;  %v5073_v35 = vrot.slane %v2481_v3, %v4021_v52 }
 0x235   : > { %6393 = vst [vmem:[#allocation70_spill] sm:$0xff] %v5061_v26  ;;  %v2701_v45 = vcombine.high %v4753_v61, %v4555_v9  ;;  %v2648_v58 = vcombine.low %v4915_v31, %v4933_v30  ;;  %v2462_v37 = vcombine.high %v5061_v26, %v6367_v18  ;;  %v5089_v3 = vrot.slane %v2428_v49, %v4413_v23 }
 0x236   : > { %v5077_v7 = vpop.permute.xlu1 %2325  ;;  %v2480_v31 = vcombine.low %v4747_v21, %v4540_v13  ;;  %v2684_v13 = vcombine.low %v4557_v1, %v4758_v33 }
 0x237   : > { %2757 = vrot.lane.b32.xlu0 %v4980_v48, %s3818_s8  ;;  %3001 = vrot.lane.b32.xlu1 %v4983_v43, %s3818_s8  ;;  %v5038_v5 = vpop.permute.xlu0 %1444  ;;  %6394 = vst [vmem:[#allocation71_spill] sm:$0xff] %v5077_v7  ;;  %6396 = vst [vmem:[#allocation73_spill] sm:$0xff] %v5089_v3  ;;  %v5096_v7 = vrot.slane %v2685_v53, %v4021_v52  ;;  %v5104_v30 = vrot.slane %v2701_v45, %v4021_v52 }
 0x238   : > { %6391 = vst [vmem:[#allocation68_spill] sm:$0xff] %v5038_v5  ;;  %v2900_v5 = vcombine.high %v5044_v59, %v6367_v18  ;;  %v2464_v59 = vcombine.low %v4542_v44, %v4755_v17  ;;  %v2460_v44 = vcombine.high %v5089_v3, %v6367_v18  ;;  %v5112_v17 = vrot.slane %v2648_v58, %v4413_v23 }
 0x239   : > { %v2733_v21 = vcombine.high %v5096_v7, %v5104_v30  ;;  %v5129_v45 = vrot.slane %v2480_v31, %v4021_v52  ;;  %v1580_v58 = vcombine.high %v4588_v0, %v4780_v57  ;;  %v2901_v3 = vcombine.high %v4858_v6, %v6367_v18 }
 0x23a   : > { %6397 = vst [vmem:[#allocation74_spill] sm:$0xff] %v5112_v17  ;;  %v5115_v53 = vrot.slane %v2464_v59, %v4021_v52  ;;  %v5121_v49 = vpop.permute.xlu1 %2333  ;;  %v2700_v59 = vcombine.low %v4753_v61, %v4555_v9  ;;  %v2680_v1 = vcombine.high %v5112_v17, %v6367_v18  ;;  %v1596_v61 = vcombine.high %v4762_v11, %v4586_v63 }
 0x23b   : > { %2092 = vrot.lane.b32.xlu0 %v5004_v56, %s3818_s8  ;;  %2128 = vrot.lane.b32.xlu1 %v5013_v50, %s3818_s8  ;;  %v5079_v24 = vpop.permute.xlu0 %1432  ;;  %6398 = vst [vmem:[#allocation75_spill] sm:$0xff] %v5121_v49  ;;  %v5146_v31 = vrot.slane %v2733_v21, %v4413_v23  ;;  %v5163_v21 = vrot.slane %v1580_v58, %v4021_v52  ;;  %v6405_v49 = vld [vmem:[#allocation56_spill] sm:$0xff] }
 0x23c   : > { %6395 = vst [vmem:[#allocation72_spill] sm:$0xff] %v5079_v24  ;;  %v2513_v24 = vcombine.high %v5066_v62, %v5073_v35  ;;  %v2497_v33 = vcombine.high %v5115_v53, %v5129_v45  ;;  %v5149_v9 = vrot.slane %v2700_v59, %v4021_v52  ;;  %v2463_v6 = vcombine.high %v4882_v16, %v6367_v18 }
 0x23e   : > { %v5166_v59 = vrot.slane %v2497_v33, %v4413_v23 }
 0x23f   : > { %1664 = vrot.lane.b32.xlu0 %v5029_v25, %s3818_s8  ;;  %2116 = vrot.lane.b32.xlu1 %v5041_v15, %s3818_s8 }
 0x243   : > { %1884 = vrot.lane.b32.xlu0 %v5058_v46, %s3818_s8  ;;  %2973 = vrot.lane.b32.xlu1 %v2900_v5, %s3817_s26  ;;  %v5099_v5 = vrot.slane %v2953_v19, %v4413_v23  ;;  %v5123_v19 = vpop.permute.xlu0 %2313 }
 0x244   : > { %6399 = vst [vmem:[#allocation76_spill] sm:$0xff] %v5123_v19  ;;  %v5155_v19 = vpop.permute.xlu1 %1428 }
 0x245   : > { %6401 = vst [vmem:[#allocation78_spill] sm:$0xff] %v5155_v19 }
 0x247   : > { %3013 = vrot.lane.b32.xlu0 %v5099_v5, %s3818_s8  ;;  %2545 = vrot.lane.b32.xlu1 %v2462_v37, %s3817_s26  ;;  %v5126_v37 = vrot.slane %v2513_v24, %v4413_v23  ;;  %v5141_v24 = vrot.slane %v2684_v13, %v4021_v52 }
 0x248   : > { %v5180_v58 = vpop.permute.xlu1 %1448 }
 0x249   : > { %v2717_v13 = vcombine.high %v5141_v24, %v5149_v9  ;;  %6403 = vst [vmem:[#allocation80_spill] sm:$0xff] %v5180_v58 }
 0x24b   : > { %2573 = vrot.lane.b32.xlu0 %v5126_v37, %s3818_s8  ;;  %2533 = vrot.lane.b32.xlu1 %v2460_v44, %s3817_s26  ;;  %v5153_v44 = vpop.permute.xlu0 %2321  ;;  %v5183_v33 = vrot.slane %v2717_v13, %v4413_v23  ;;  %v1848_v13 = vcombine.high %v4822_v27, %v4830_v2 }
 0x24c   : > { %6400 = vst [vmem:[#allocation77_spill] sm:$0xff] %v5153_v44  ;;  %v5171_v44 = vrot.slane %v1596_v61, %v4021_v52  ;;  %v1779_v61 = vcombine.low %v5001_v47, %v5016_v32  ;;  %v5203_v26 = vpop.permute.xlu1 %2349  ;;  %v2681_v47 = vcombine.high %v4980_v48, %v6367_v18 }
 0x24d   : > { %v5211_v32 = vrot.slane %v1848_v13, %v4413_v23 }
 0x24f   : > { %2793 = vrot.lane.b32.xlu0 %v5146_v31, %s3818_s8  ;;  %2753 = vrot.lane.b32.xlu1 %v2680_v1, %s3817_s26  ;;  %v1628_v1 = vcombine.high %v5163_v21, %v5171_v44  ;;  %v5178_v19 = vpop.permute.xlu0 %1440 }
 0x250   : > { %6402 = vst [vmem:[#allocation79_spill] sm:$0xff] %v5178_v19  ;;  %v6404_v19 = vld [vmem:[#allocation55_spill] sm:$0xff] }
 0x251   : > { %v2884_v58 = vcombine.low %v6405_v49, %v6404_v19  ;;  %v5199_v17 = vrot.slane %v1628_v1, %v4413_v23  ;;  %v5219_v19 = vrot.slane %v1779_v61, %v4413_v23  ;;  %v6407_v1 = vld [vmem:[#allocation57_spill] sm:$0xff] }
 0x253   : > { %2561 = vrot.lane.b32.xlu0 %v5166_v59, %s3818_s8  ;;  %2981 = vrot.lane.b32.xlu1 %v2901_v3, %s3819_s18  ;;  %v2683_v3 = vcombine.high %v4925_v42, %v6367_v18  ;;  %v5201_v16 = vpop.permute.xlu0 %2337  ;;  %v2664_v42 = vcombine.low %v4843_v51, %v4863_v54  ;;  %v5216_v49 = vrot.slane %v2884_v58, %v4413_v23 }
 0x254   : > { %6406 = vst [vmem:[#allocation55_spill] sm:$0xff] %v5201_v16  ;;  %v1543_v51 = vcombine.low %v6407_v1, %v4866_v36  ;;  %v1797_v58 = vcombine.high %v5219_v19, %v6367_v18  ;;  %v1763_v36 = vcombine.low %v4887_v8, %v4900_v38  ;;  %v6411_v1 = vld [vmem:[#allocation59_spill] sm:$0xff]  ;;  %v1983_v8 = vcombine.low %v4943_v12, %v4962_v20  ;;  %v6412_v38 = vld [vmem:[#allocation58_spill] sm:$0xff] }
 0x255   : > { %v2902_v48 = vcombine.high %v5216_v49, %v6367_v18  ;;  %v2018_v16 = vcombine.high %v6411_v1, %v6367_v18  ;;  %v2936_v12 = vcombine.low %v4922_v41, %v4936_v4 }
 0x257   : > { %2781 = vrot.lane.b32.xlu0 %v5183_v33, %s3818_s8  ;;  %2553 = vrot.lane.b32.xlu1 %v2463_v6, %s3819_s18  ;;  %v5226_v54 = vpop.permute.xlu0 %2357  ;;  %v5228_v6 = vpop.permute.xlu1 %1436 }
 0x258   : > { %6408 = vst [vmem:[#allocation56_spill] sm:$0xff] %v5226_v54  ;;  %6409 = vst [vmem:[#allocation57_spill] sm:$0xff] %v5228_v6  ;;  %v6414_v54 = vld [vmem:[#allocation50_spill] sm:$0xff] }
 0x25b   : > { %1688 = vrot.lane.b32.xlu0 %v5199_v17, %s3818_s8  ;;  %2773 = vrot.lane.b32.xlu1 %v2683_v3, %s3819_s18  ;;  %v5235_v3 = vrot.slane %v2664_v42, %v4413_v23  ;;  %v5241_v61 = vpop.permute.xlu0 %1215  ;;  %v5250_v42 = vrot.slane %v1543_v51, %v4413_v23  ;;  %v5267_v51 = vrot.slane %v1763_v36, %v4413_v23 }
 0x25c   : > { %v5282_v36 = vrot.slane %v1983_v8, %v4413_v23  ;;  %v2016_v8 = vcombine.high %v5004_v56, %v6367_v18 }
 0x25e   : > { %v5243_v13 = vpop.permute.xlu1 %775 }
 0x25f   : > { %1908 = vrot.lane.b32.xlu0 %v5211_v32, %s3818_s8  ;;  %2761 = vrot.lane.b32.xlu1 %v2681_v47, %s3819_s18  ;;  %6410 = vst [vmem:[#allocation81_spill] sm:$0xff] %v5243_v13  ;;  %v2682_v47 = vcombine.high %v5235_v3, %v6367_v18  ;;  %v6413_v13 = vld [vmem:[#allocation51_spill] sm:$0xff] }
 0x260   : > { %v6415_v1 = vcombine.low %v6413_v13, %v6414_v54  ;;  %v1795_v54 = vcombine.high %v5267_v51, %v6367_v18  ;;  %v1559_v13 = vcombine.low %v4973_v39, %v4986_v14  ;;  %v2952_v14 = vcombine.low %v5032_v29, %v5047_v28 }
 0x261   : > { %v2461_v39 = vcombine.high %v4956_v40, %v6367_v18  ;;  %v2496_v40 = vcombine.low %v5115_v53, %v5129_v45  ;;  %v1576_v45 = vcombine.high %v4928_v60, %v6367_v18 }
 0x262   : > { %v5264_v6 = vrot.slane %v6415_v1, %v4413_v23 }
 0x263   : > { %2985 = vrot.lane.b32.xlu0 %v2902_v48, %s3817_s26  ;;  %1880 = vrot.lane.b32.xlu1 %v1797_v58, %s3817_s26  ;;  %v2903_v48 = vcombine.high %v6412_v38, %v6367_v18  ;;  %v1575_v58 = vcombine.high %v5250_v42, %v6367_v18  ;;  %v2512_v38 = vcombine.low %v5066_v62, %v5073_v35 }
 0x264   : > { %v2017_v20 = vcombine.high %v5264_v6, %v6367_v18  ;;  %v5310_v35 = vrot.slane %v1559_v13, %v4413_v23 }
 0x265   : > { %v5313_v56 = vrot.slane %v2512_v38, %v4413_v23 }
 0x266   : > { %v1577_v29 = vcombine.high %v5310_v35, %v6367_v18 }
 0x267   : > { %2765 = vrot.lane.b32.xlu0 %v2682_v47, %s3817_s26  ;;  %2108 = vrot.lane.b32.xlu1 %v2018_v16, %s3819_s18  ;;  %v5269_v47 = vpop.permute.xlu0 %1203  ;;  %v5271_v16 = vpop.permute.xlu1 %995  ;;  %6420 = vst [vmem:[#allocation82_spill] sm:$0xff] %v5313_v56  ;;  %v2530_v28 = vcombine.high %v5313_v56, %v6367_v18 }
 0x268   : > { %6416 = vst [vmem:[#allocation59_spill] sm:$0xff] %v5271_v16 }
 0x26b   : > { %2993 = vrot.lane.b32.xlu0 %v2903_v48, %s3819_s18  ;;  %1648 = vrot.lane.b32.xlu1 %v1575_v58, %s3817_s26  ;;  %v5290_v41 = vpop.permute.xlu0 %771  ;;  %v5292_v4 = vpop.permute.xlu1 %763  ;;  %v2015_v48 = vcombine.high %v5282_v36, %v6367_v18  ;;  %v5299_v58 = vrot.slane %v2936_v12, %v4413_v23 }
 0x26c   : > { %6417 = vst [vmem:[#allocation58_spill] sm:$0xff] %v5290_v41  ;;  %6418 = vst [vmem:[#allocation51_spill] sm:$0xff] %v5292_v4  ;;  %v6454_v4 = vld [vmem:[#allocation11_spill] sm:$0xff] }
 0x26d   : > { %6419 = vst [vmem:[#allocation50_spill] sm:$0xff] %v5299_v58  ;;  %v2968_v62 = vcombine.high %v5299_v58, %v6367_v18 }
 0x26f   : > { %2100 = vrot.lane.b32.xlu0 %v2017_v20, %s3817_s26  ;;  %1868 = vrot.lane.b32.xlu1 %v1795_v54, %s3817_s26  ;;  %v5315_v1 = vpop.permute.xlu0 %759  ;;  %v5317_v12 = vpop.permute.xlu1 %983  ;;  %v5328_v20 = vrot.slane %v2952_v14, %v4413_v23  ;;  %v2716_v54 = vcombine.low %v5141_v24, %v5149_v9  ;;  %v2732_v24 = vcombine.low %v5096_v7, %v5104_v30 }
 0x270   : > { %6421 = vst [vmem:[#allocation83_spill] sm:$0xff] %v5315_v1  ;;  %6422 = vst [vmem:[#allocation84_spill] sm:$0xff] %v5317_v12  ;;  %v1578_v9 = vcombine.high %v5029_v25, %v6367_v18  ;;  %v1798_v7 = vcombine.high %v5058_v46, %v6367_v18  ;;  %v2969_v46 = vcombine.high %v4983_v43, %v6367_v18 }
 0x271   : > { %v2970_v53 = vcombine.high %v5328_v20, %v6367_v18  ;;  %v5354_v14 = vrot.slane %v2716_v54, %v4413_v23  ;;  %v5367_v30 = vrot.slane %v2732_v24, %v4413_v23  ;;  %v2971_v54 = vcombine.high %v5099_v5, %v6367_v18 }
 0x273   : > { %2088 = vrot.lane.b32.xlu0 %v2015_v48, %s3817_s26  ;;  %2096 = vrot.lane.b32.xlu1 %v2016_v8, %s3819_s18  ;;  %v5334_v13 = vpop.permute.xlu0 %979  ;;  %v5336_v38 = vpop.permute.xlu1 %1211  ;;  %v5343_v48 = vrot.slane %v2496_v40, %v4413_v23  ;;  %6425 = vst [vmem:[#allocation87_spill] sm:$0xff] %v5354_v14  ;;  %v2748_v25 = vcombine.high %v5354_v14, %v6367_v18  ;;  %6427 = vst [vmem:[#allocation89_spill] sm:$0xff] %v5367_v30  ;;  %v6473_v14 = vld [vmem:[#allocation40_spill] sm:$0xff] }
 0x274   : > { %6423 = vst [vmem:[#allocation85_spill] sm:$0xff] %v5334_v13 }
 0x275   : > { %6424 = vst [vmem:[#allocation86_spill] sm:$0xff] %v5343_v48  ;;  %v2528_v8 = vcombine.high %v5343_v48, %v6367_v18 }
 0x277   : > { %2541 = vrot.lane.b32.xlu0 %v2461_v39, %s3819_s18  ;;  %2997 = vrot.lane.b32.xlu1 %v2968_v62, %s3817_s26  ;;  %v5356_v60 = vpop.permute.xlu0 %1207  ;;  %v5358_v39 = vpop.permute.xlu1 %1199 }
 0x278   : > { %6426 = vst [vmem:[#allocation88_spill] sm:$0xff] %v5356_v60 }
 0x27b   : > { %1660 = vrot.lane.b32.xlu0 %v1577_v29, %s3817_s26  ;;  %2569 = vrot.lane.b32.xlu1 %v2530_v28, %s3817_s26  ;;  %v5371_v62 = vpop.permute.xlu0 %779  ;;  %v5373_v40 = vpop.permute.xlu1 %991  ;;  %v2750_v29 = vcombine.high %v5367_v30, %v6367_v18  ;;  %v1579_v28 = vcombine.low %v4588_v0, %v4780_v57  ;;  %v6430_v0 = vld [vmem:[#allocation54_spill] sm:$0xff] }
 0x27c   : > { %6428 = vst [vmem:[#allocation90_spill] sm:$0xff] %v5371_v62  ;;  %v6431_v57 = vld [vmem:[#allocation38_spill] sm:$0xff] }
 0x27d   : > { %v5396_v43 = vrot.slane %v1579_v28, %v4021_v52  ;;  %v1799_v5 = vcombine.low %v6431_v57, %v6430_v0  ;;  %v6436_v28 = vld [vmem:[#allocation53_spill] sm:$0xff] }
 0x27f   : > { %3009 = vrot.lane.b32.xlu0 %v2970_v53, %s3817_s26  ;;  %1656 = vrot.lane.b32.xlu1 %v1576_v45, %s3819_s18  ;;  %v2531_v53 = vcombine.high %v5126_v37, %v6367_v18  ;;  %v1595_v45 = vcombine.low %v4762_v11, %v4586_v63  ;;  %v5389_v24 = vpop.permute.xlu0 %999  ;;  %v1627_v37 = vcombine.low %v5163_v21, %v5171_v44 }
 0x280   : > { %6429 = vst [vmem:[#allocation91_spill] sm:$0xff] %v5389_v24  ;;  %v2751_v11 = vcombine.high %v5146_v31, %v6367_v18  ;;  %v5422_v31 = vrot.slane %v1799_v5, %v4021_v52 }
 0x281   : > { %v5439_v57 = vrot.slane %v1627_v37, %v4413_v23 }
 0x283   : > { %1668 = vrot.lane.b32.xlu0 %v1578_v9, %s3819_s18  ;;  %2557 = vrot.lane.b32.xlu1 %v2528_v8, %s3817_s26  ;;  %v5391_v9 = vpop.permute.xlu1 %1219  ;;  %v6432_v8 = vld [vmem:[#allocation64_spill] sm:$0xff]  ;;  %v5424_v21 = vpop.permute.xlu0 %987  ;;  %6441 = vst [vmem:[#allocation53_spill] sm:$0xff] %v5439_v57 }
 0x284   : > { %v1796_v63 = vcombine.high %v6432_v8, %v6367_v18  ;;  %6437 = vst [vmem:[#allocation38_spill] sm:$0xff] %v5424_v21 }
 0x287   : > { %1888 = vrot.lane.b32.xlu0 %v1798_v7, %s3819_s18  ;;  %2777 = vrot.lane.b32.xlu1 %v2748_v25, %s3817_s26  ;;  %v6433_v7 = vcombine.low %v4776_v55, %v4770_v22  ;;  %v5426_v22 = vpop.permute.xlu1 %767 }
 0x288   : > { %6438 = vst [vmem:[#allocation64_spill] sm:$0xff] %v5426_v22 }
 0x289   : > { %v5410_v25 = vrot.slane %v6433_v7, %v4413_v23  ;;  %v6444_v7 = vld [vmem:[#allocation22_spill] sm:$0xff] }
 0x28b   : > { %2789 = vrot.lane.b32.xlu0 %v2750_v29, %s3817_s26  ;;  %3005 = vrot.lane.b32.xlu1 %v2969_v46, %s3819_s18  ;;  %6434 = vst [vmem:[#allocation54_spill] sm:$0xff] %v5410_v25  ;;  %v5413_v29 = vrot.slane %v1595_v45, %v4021_v52  ;;  %v6435_v46 = vld [vmem:[#allocation37_spill] sm:$0xff]  ;;  %v2085_v55 = vcombine.high %v5410_v25, %v6367_v18  ;;  %v6455_v25 = vld [vmem:[#allocation12_spill] sm:$0xff] }
 0x28c   : > { %v6439_v45 = vcombine.low %v4773_v10, %v4767_v34  ;;  %v1645_v10 = vcombine.high %v5439_v57, %v6367_v18  ;;  %v6449_v57 = vld [vmem:[#allocation39_spill] sm:$0xff]  ;;  %v6456_v1 = vcombine.high %v6454_v4, %v6455_v25  ;;  %v6460_v25 = vld [vmem:[#allocation13_spill] sm:$0xff] }
 0x28d   : > { %v1611_v44 = vcombine.low %v5396_v43, %v5413_v29 }
 0x28e   : > { %v5436_v0 = vrot.slane %v6439_v45, %v4413_v23  ;;  %v442_v62 = vrot.slane %v6456_v1, %v4413_v23 }
 0x28f   : > { %3017 = vrot.lane.b32.xlu0 %v2971_v54, %s3819_s18  ;;  %2577 = vrot.lane.b32.xlu1 %v2531_v53, %s3819_s18  ;;  %v1815_v54 = vcombine.low %v6436_v28, %v6435_v46  ;;  %v2749_v53 = vcombine.high %v5183_v33, %v6367_v18  ;;  %v5457_v37 = vrot.slane %v1611_v44, %v4413_v23 }
 0x290   : > { %6440 = vst [vmem:[#allocation37_spill] sm:$0xff] %v5436_v0  ;;  %v2083_v34 = vcombine.high %v5436_v0, %v6367_v18  ;;  %v6445_v44 = vcombine.low %v4822_v27, %v4830_v2 }
 0x291   : > { %v5442_v5 = vrot.slane %v1815_v54, %v4021_v52  ;;  %6442 = vst [vmem:[#allocation92_spill] sm:$0xff] %v5457_v37 }
 0x292   : > { %v5475_v45 = vrot.slane %v6445_v44, %v4413_v23  ;;  %v2086_v44 = vcombine.high %v5013_v50, %v6367_v18 }
 0x293   : > { %1876 = vrot.lane.b32.xlu0 %v1796_v63, %s3819_s18  ;;  %2797 = vrot.lane.b32.xlu1 %v2751_v11, %s3819_s18  ;;  %v1831_v8 = vcombine.low %v5422_v31, %v5442_v5  ;;  %v6443_v11 = vld [vmem:[#allocation41_spill] sm:$0xff] }
 0x294   : > { %v1131_v46 = vcombine.high %v6444_v7, %v6443_v11  ;;  %6446 = vst [vmem:[#allocation41_spill] sm:$0xff] %v5475_v45  ;;  %v1865_v2 = vcombine.high %v5475_v45, %v6367_v18  ;;  %v2084_v45 = vcombine.high %v5041_v15, %v6367_v18  ;;  %v6458_v15 = vld [vmem:[#allocation28_spill] sm:$0xff] }
 0x297   : > { %2124 = vrot.lane.b32.xlu0 %v2085_v55, %s3817_s26  ;;  %2785 = vrot.lane.b32.xlu1 %v2749_v53, %s3819_s18  ;;  %v2529_v55 = vcombine.high %v5166_v59, %v6367_v18  ;;  %v1643_v53 = vcombine.high %v5457_v37, %v6367_v18  ;;  %v5485_v59 = vrot.slane %v1131_v46, %v4021_v52 }
 0x299   : > { %v5448_v33 = vpop.permute.xlu0 %2989  ;;  %v5450_v63 = vpop.permute.xlu1 %2977 }
 0x29b   : > { %2112 = vrot.lane.b32.xlu0 %v2083_v34, %s3817_s26  ;;  %1684 = vrot.lane.b32.xlu1 %v1645_v10, %s3817_s26  ;;  %v5478_v34 = vrot.slane %v1831_v8, %v4413_v23  ;;  %v6448_v10 = vld [vmem:[#allocation21_spill] sm:$0xff] }
 0x29c   : > { %v1147_v0 = vcombine.high %v6449_v57, %v6448_v10 }
 0x29d   : > { %v5463_v28 = vpop.permute.xlu0 %2549  ;;  %v5465_v54 = vpop.permute.xlu1 %2104  ;;  %6447 = vst [vmem:[#allocation22_spill] sm:$0xff] %v5478_v34  ;;  %v1863_v27 = vcombine.high %v5478_v34, %v6367_v18 }
 0x29e   : > { %v1161_v8 = vrot.slane %v1147_v0, %v4021_v52  ;;  %v6452_v0 = vld [vmem:[#allocation30_spill] sm:$0xff] }
 0x29f   : > { %2565 = vrot.lane.b32.xlu0 %v2529_v55, %s3819_s18  ;;  %1672 = vrot.lane.b32.xlu1 %v1643_v53, %s3817_s26 }
 0x2a0   : > { %v1178_v55 = vcombine.low %v5485_v59, %v1161_v8 }
 0x2a1   : > { %v5487_v37 = vpop.permute.xlu0 %2769  ;;  %v5489_v22 = vpop.permute.xlu1 %1652 }
 0x2a2   : > { %6450 = vst [vmem:[#allocation21_spill] sm:$0xff] %v5489_v22  ;;  %v5520_v50 = vrot.slane %v1178_v55, %v4413_v23  ;;  %v6461_v55 = vld [vmem:[#allocation14_spill] sm:$0xff] }
 0x2a3   : > { %1904 = vrot.lane.b32.xlu0 %v1865_v2, %s3817_s26  ;;  %1892 = vrot.lane.b32.xlu1 %v1863_v27, %s3817_s26  ;;  %v2309_v2 = vcombine.high %v6452_v0, %v6367_v18  ;;  %v1612_v0 = vcombine.high %v5396_v43, %v5413_v29  ;;  %v1832_v29 = vcombine.high %v5422_v31, %v5442_v5 }
 0x2a4   : > { %6457 = vst [vmem:[#allocation11_spill] sm:$0xff] %v5520_v50  ;;  %v1196_v1 = vcombine.high %v5520_v50, %v6367_v18 }
 0x2a5   : > { %v5499_v46 = vpop.permute.xlu0 %2537  ;;  %v5501_v53 = vpop.permute.xlu1 %1872  ;;  %v1626_v50 = vrot.slane %v1612_v0, %v4413_v23  ;;  %v6466_v0 = vld [vmem:[#allocation44_spill] sm:$0xff] }
 0x2a6   : > { %6451 = vst [vmem:[#allocation39_spill] sm:$0xff] %v5501_v53  ;;  %v6474_v53 = vld [vmem:[#allocation25_spill] sm:$0xff] }
 0x2a7   : > { %2132 = vrot.lane.b32.xlu0 %v2086_v44, %s3819_s18  ;;  %2120 = vrot.lane.b32.xlu1 %v2084_v45, %s3819_s18  ;;  %v462_v45 = vcombine.high %v6458_v15, %v6367_v18  ;;  %v1130_v44 = vcombine.low %v6444_v7, %v6443_v11  ;;  %v1146_v15 = vcombine.low %v6449_v57, %v6448_v10 }
 0x2a9   : > { %v5511_v27 = vpop.permute.xlu0 %2757  ;;  %v5513_v34 = vpop.permute.xlu1 %3001  ;;  %v5547_v43 = vrot.slane %v1130_v44, %v4021_v52  ;;  %v5559_v57 = vrot.slane %v1146_v15, %v4021_v52  ;;  %v1846_v44 = vrot.slane %v1832_v29, %v4413_v23 }
 0x2aa   : > { %6453 = vst [vmem:[#allocation30_spill] sm:$0xff] %v5513_v34 }
 0x2ab   : > { %2345 = vrot.lane.b32.xlu0 %v2309_v2, %s3819_s18  ;;  %536 = vrot.lane.b32.xlu1 %v442_v62, %s3818_s8  ;;  %v6462_v2 = vcombine.low %v6460_v25, %v6461_v55  ;;  %v1162_v10 = vcombine.low %v5547_v43, %v5559_v57 }
 0x2ad   : > { %v5530_v41 = vpop.permute.xlu0 %2092  ;;  %v5532_v4 = vpop.permute.xlu1 %2128  ;;  %v5540_v48 = vrot.slane %v6462_v2, %v4413_v23  ;;  %v5587_v29 = vrot.slane %v1162_v10, %v4413_v23 }
 0x2ae   : > { %6459 = vst [vmem:[#allocation12_spill] sm:$0xff] %v5532_v4  ;;  %v6469_v4 = vld [vmem:[#allocation26_spill] sm:$0xff] }
 0x2af   : > { %6463 = vst [vmem:[#allocation28_spill] sm:$0xff] %v5540_v48  ;;  %552 = vrot.lane.b32.xlu0 %v462_v45, %s3819_s18  ;;  %1235 = vrot.lane.b32.xlu1 %v1196_v1, %s3817_s26  ;;  %v1425_v2 = vcombine.high %v5540_v48, %v6367_v18  ;;  %v1646_v45 = vcombine.high %v5199_v17, %v6367_v18  ;;  %v6467_v1 = vld [vmem:[#allocation24_spill] sm:$0xff] }
 0x2b0   : > { %v691_v15 = vcombine.high %v6467_v1, %v6466_v0  ;;  %v1179_v48 = vcombine.high %v5485_v59, %v1161_v8  ;;  %v1866_v17 = vcombine.high %v5211_v32, %v6367_v18  ;;  %6471 = vst [vmem:[#allocation24_spill] sm:$0xff] %v5587_v29  ;;  %v6476_v59 = vld [vmem:[#allocation15_spill] sm:$0xff]  ;;  %v6477_v8 = vld [vmem:[#allocation16_spill] sm:$0xff] }
 0x2b1   : > { %v5551_v11 = vpop.permute.xlu0 %1664  ;;  %v5553_v7 = vpop.permute.xlu1 %2116  ;;  %v6478_v60 = vcombine.low %v6476_v59, %v6477_v8 }
 0x2b2   : > { %6464 = vst [vmem:[#allocation13_spill] sm:$0xff] %v5551_v11  ;;  %6465 = vst [vmem:[#allocation14_spill] sm:$0xff] %v5553_v7  ;;  %v6468_v7 = vld [vmem:[#allocation46_spill] sm:$0xff]  ;;  %v705_v32 = vrot.slane %v691_v15, %v4021_v52  ;;  %v1644_v11 = vcombine.high %v1626_v50, %v6367_v18 }
 0x2b3   : > { %1464 = vrot.lane.b32.xlu0 %v1425_v2, %s3817_s26  ;;  %1676 = vrot.lane.b32.xlu1 %v1626_v50, %s3818_s8  ;;  %v460_v2 = vcombine.high %v442_v62, %v6367_v18  ;;  %v911_v24 = vcombine.high %v6469_v4, %v6468_v7  ;;  %v6475_v62 = vld [vmem:[#allocation43_spill] sm:$0xff]  ;;  %v5599_v30 = vrot.slane %v6478_v60, %v4413_v23 }
 0x2b4   : > { %v927_v16 = vcombine.high %v6475_v62, %v6474_v53 }
 0x2b5   : > { %v5565_v31 = vpop.permute.xlu0 %1884  ;;  %v5567_v5 = vpop.permute.xlu1 %2973  ;;  %6479 = vst [vmem:[#allocation46_spill] sm:$0xff] %v5599_v30  ;;  %v5603_v10 = vrot.slane %v911_v24, %v4021_v52 }
 0x2b6   : > { %v5614_v58 = vrot.slane %v927_v16, %v4021_v52  ;;  %v6482_v16 = vcombine.high %v6460_v25, %v6461_v55 }
 0x2b7   : > { %1692 = vrot.lane.b32.xlu0 %v1646_v45, %s3819_s18  ;;  %1896 = vrot.lane.b32.xlu1 %v1846_v44, %s3818_s8  ;;  %v6472_v45 = vld [vmem:[#allocation23_spill] sm:$0xff] }
 0x2b8   : > { %v707_v34 = vcombine.high %v6473_v14, %v6472_v45  ;;  %v958_v24 = vcombine.low %v5603_v10, %v5614_v58  ;;  %v706_v55 = vcombine.low %v6473_v14, %v6472_v45 }
 0x2b9   : > { %v5580_v21 = vpop.permute.xlu0 %3013  ;;  %v5582_v12 = vpop.permute.xlu1 %2545 }
 0x2ba   : > { %6470 = vst [vmem:[#allocation44_spill] sm:$0xff] %v5580_v21  ;;  %v721_v56 = vrot.slane %v707_v34, %v4021_v52  ;;  %v1422_v34 = vrot.slane %v6482_v16, %v4413_v23  ;;  %v5644_v25 = vrot.slane %v958_v24, %v4413_v23 }
 0x2bb   : > { %1912 = vrot.lane.b32.xlu0 %v1866_v17, %s3819_s18  ;;  %540 = vrot.lane.b32.xlu1 %v460_v2, %s3819_s18  ;;  %v1194_v17 = vcombine.high %v5587_v29, %v6367_v18  ;;  %v1193_v2 = vrot.slane %v1179_v48, %v4413_v23  ;;  %v1423_v48 = vcombine.high %v5599_v30, %v6367_v18 }
 0x2bc   : > { %v738_v60 = vcombine.low %v705_v32, %v721_v56  ;;  %v1864_v30 = vcombine.high %v1846_v44, %v6367_v18  ;;  %v910_v44 = vcombine.low %v6469_v4, %v6468_v7  ;;  %v976_v14 = vcombine.high %v5644_v25, %v6367_v18 }
 0x2bd   : > { %v5605_v13 = vpop.permute.xlu0 %2573  ;;  %v5607_v21 = vpop.permute.xlu1 %2533 }
 0x2be   : > { %6480 = vst [vmem:[#allocation26_spill] sm:$0xff] %v5605_v13  ;;  %v5641_v22 = vrot.slane %v738_v60, %v4413_v23 }
 0x2bf   : > { %1223 = vrot.lane.b32.xlu0 %v1194_v17, %s3817_s26  ;;  %1239 = vrot.lane.b32.xlu1 %v1193_v2, %s3818_s8  ;;  %v690_v17 = vcombine.low %v6467_v1, %v6466_v0  ;;  %v1163_v0 = vcombine.high %v5547_v43, %v5559_v57  ;;  %v926_v43 = vcombine.low %v6475_v62, %v6474_v53 }
 0x2c0   : > { %v756_v24 = vcombine.high %v5641_v22, %v6367_v18  ;;  %v6483_v53 = vcombine.high %v6476_v59, %v6477_v8  ;;  %v959_v59 = vcombine.high %v5603_v10, %v5614_v58  ;;  %v6485_v10 = vld [vmem:[#allocation69_spill] sm:$0xff] }
 0x2c1   : > { %v5620_v15 = vpop.permute.xlu0 %2793  ;;  %v5622_v13 = vpop.permute.xlu1 %2753  ;;  %v5653_v50 = vrot.slane %v690_v17, %v4021_v52  ;;  %v1177_v45 = vrot.slane %v1163_v0, %v4413_v23  ;;  %v5680_v16 = vrot.slane %v926_v43, %v4021_v52  ;;  %v739_v17 = vcombine.high %v705_v32, %v721_v56 }
 0x2c2   : > { %6481 = vst [vmem:[#allocation23_spill] sm:$0xff] %v5620_v15  ;;  %v1406_v62 = vrot.slane %v6483_v53, %v4413_v23  ;;  %v3020_v43 = vsel %vm579_vm14, %v6485_v10, %v5567_v5 }
 0x2c3   : > { %1452 = vrot.lane.b32.xlu0 %v1423_v48, %s3817_s26  ;;  %1468 = vrot.lane.b32.xlu1 %v1422_v34, %s3818_s8  ;;  %v1197_v48 = vcombine.high %v1193_v2, %v6367_v18  ;;  %v1426_v2 = vcombine.high %v1422_v34, %v6367_v18 }
 0x2c5   : > { %v5634_v29 = vpop.permute.xlu0 %2561  ;;  %v5636_v15 = vpop.permute.xlu1 %2981 }
 0x2c7   : > { %1680 = vrot.lane.b32.xlu0 %v1644_v11, %s3819_s18  ;;  %1900 = vrot.lane.b32.xlu1 %v1864_v30, %s3819_s18  ;;  %v5664_v30 = vrot.slane %v706_v55, %v4021_v52  ;;  %v5673_v11 = vrot.slane %v910_v44, %v4021_v52 }
 0x2c9   : > { %v5657_v1 = vpop.permute.xlu0 %2781  ;;  %v2554_v60 = vpop.permute.xlu1 %2553  ;;  %v722_v4 = vcombine.low %v5653_v50, %v5664_v30  ;;  %v942_v55 = vcombine.low %v5673_v11, %v5680_v16 }
 0x2cb   : > { %795 = vrot.lane.b32.xlu0 %v756_v24, %s3817_s26  ;;  %1015 = vrot.lane.b32.xlu1 %v976_v14, %s3817_s26  ;;  %v5694_v52 = vrot.slane %v722_v4, %v4413_v23  ;;  %v753_v24 = vrot.slane %v739_v17, %v4413_v23  ;;  %v5706_v34 = vrot.slane %v942_v55, %v4413_v23  ;;  %v6484_v14 = vld [vmem:[#allocation70_spill] sm:$0xff] }
 0x2cc   : > { %v2583_v58 = vsel %vm579_vm14, %v6484_v14, %v5582_v12  ;;  %v973_v17 = vrot.slane %v959_v59, %v4413_v23  ;;  %v6486_v12 = vld [vmem:[#allocation74_spill] sm:$0xff]  ;;  %v723_v59 = vcombine.high %v5653_v50, %v5664_v30  ;;  %v1195_v50 = vcombine.high %v1177_v45, %v6367_v18  ;;  %v6487_v30 = vld [vmem:[#allocation71_spill] sm:$0xff] }
 0x2cd   : > { %v5675_v7 = vpop.permute.xlu0 %1688  ;;  %v2774_v57 = vpop.permute.xlu1 %2773  ;;  %v754_v32 = vcombine.high %v5694_v52, %v6367_v18  ;;  %v974_v53 = vcombine.high %v5706_v34, %v6367_v18  ;;  %v2800_v5 = vsel %vm579_vm14, %v6486_v12, %v5622_v13 }
 0x2cf   : > { %1227 = vrot.lane.b32.xlu0 %v1177_v45, %s3818_s8  ;;  %1243 = vrot.lane.b32.xlu1 %v1197_v48, %s3819_s18 }
 0x2d1   : > { %v5690_v44 = vpop.permute.xlu0 %1908  ;;  %v2762_v0 = vpop.permute.xlu1 %2761 }
 0x2d3   : > { %1456 = vrot.lane.b32.xlu0 %v1406_v62, %s3818_s8  ;;  %1472 = vrot.lane.b32.xlu1 %v1426_v2, %s3819_s18 }
 0x2d5   : > { %v2986_v8 = vpop.permute.xlu0 %2985  ;;  %v5700_v56 = vpop.permute.xlu1 %1880 }
 0x2d6   : > { %v3023_v55 = vsel %vm579_vm14, %v5216_v49, %v2986_v8  ;;  %v3021_v49 = vsel %vm581_vm15, %v3020_v43, %v5450_v63  ;;  %v1424_v8 = vcombine.high %v1406_v62, %v6367_v18  ;;  %v6488_v63 = vld [vmem:[#allocation31_spill] sm:$0xff]  ;;  %v2801_v62 = vsel %vm581_vm15, %v2800_v5, %v5511_v27  ;;  %v6489_v43 = vld [vmem:[#allocation17_spill] sm:$0xff]  ;;  %v6492_v5 = vld [vmem:[#allocation62_spill] sm:$0xff] }
 0x2d7   : > { %783 = vrot.lane.b32.xlu0 %v754_v32, %s3817_s26  ;;  %799 = vrot.lane.b32.xlu1 %v753_v24, %s3818_s8  ;;  %v2584_v32 = vsel %vm581_vm15, %v2583_v58, %v5463_v28  ;;  %v3022_v13 = vsel %vm583_vm0, %v3021_v49, %v5636_v15  ;;  %v3024_v14 = vsel %vm581_vm15, %v3023_v55, %v5448_v33 }
 0x2d8   : > { %v2802_v55 = vsel %vm583_vm0, %v2801_v62, %v2762_v0  ;;  %v3096_v45 = vrot.slane %v3022_v13, 4  ;;  %v943_v27 = vcombine.high %v5673_v11, %v5680_v16  ;;  %v6497_v62 = vld [vmem:[#allocation73_spill] sm:$0xff] }
 0x2d9   : > { %v2766_v4 = vpop.permute.xlu0 %2765  ;;  %v5716_v48 = vpop.permute.xlu1 %2108 }
 0x2da   : > { %v2803_v2 = vsel %vm579_vm14, %v5235_v3, %v2766_v4  ;;  %v2585_v3 = vsel %vm583_vm0, %v2584_v32, %v2554_v60  ;;  %v2363_v60 = vsel %vm579_vm14, %v6488_v63, %v6487_v30  ;;  %v6495_v30 = vld [vmem:[#allocation20_spill] sm:$0xff] }
 0x2db   : > { %1003 = vrot.lane.b32.xlu0 %v974_v53, %s3817_s26  ;;  %1019 = vrot.lane.b32.xlu1 %v973_v17, %s3818_s8  ;;  %v2804_v28 = vsel %vm581_vm15, %v2803_v2, %v5487_v37  ;;  %v6490_v37 = vld [vmem:[#allocation18_spill] sm:$0xff]  ;;  %v3085_v33 = vrot.slane %v2585_v3, 4  ;;  %v2364_v32 = vsel %vm581_vm15, %v2363_v60, %v6492_v5  ;;  %v737_v3 = vrot.slane %v723_v59, %v4413_v23 }
 0x2dc   : > { %v6491_v4 = vcombine.low %v6489_v43, %v6490_v37  ;;  %v2805_v12 = vsel %vm583_vm0, %v2804_v28, %v2774_v57  ;;  %v3125_v57 = vsel %vm3104_vm1, %v2802_v55, %v3096_v45  ;;  %v957_v59 = vrot.slane %v943_v27, %v4413_v23  ;;  %v6499_v55 = vld [vmem:[#allocation32_spill] sm:$0xff] }
 0x2dd   : > { %v2994_v58 = vpop.permute.xlu0 %2993  ;;  %v5744_v10 = vpop.permute.xlu1 %1648 }
 0x2de   : > { %v3025_v15 = vsel %vm583_vm0, %v3024_v14, %v2994_v58  ;;  %v5757_v53 = vrot.slane %v6491_v4, %v4413_v23  ;;  %v6493_v58 = vld [vmem:[#allocation75_spill] sm:$0xff]  ;;  %v757_v4 = vcombine.high %v753_v24, %v6367_v18  ;;  %v977_v24 = vcombine.high %v973_v17, %v6367_v18 }
 0x2df   : > { %v3097_v2 = vrot.slane %v3025_v15, 4  ;;  %1231 = vrot.lane.b32.xlu0 %v1195_v50, %s3819_s18  ;;  %1460 = vrot.lane.b32.xlu1 %v1424_v8, %s3819_s18  ;;  %v2365_v8 = vsel %vm583_vm0, %v2364_v32, %v6493_v58  ;;  %v6494_v50 = vld [vmem:[#allocation19_spill] sm:$0xff]  ;;  %v2580_v15 = vsel %vm579_vm14, %v6497_v62, %v5607_v21  ;;  %v6500_v32 = vld [vmem:[#allocation66_spill] sm:$0xff]  ;;  %v6502_v17 = vcombine.high %v6489_v43, %v6490_v37 }
 0x2e0   : > { %v529_v13 = vcombine.high %v5757_v53, %v6367_v18  ;;  %v3122_v11 = vsel %vm3104_vm1, %v2365_v8, %v3085_v33  ;;  %v6496_v63 = vcombine.low %v6494_v50, %v6495_v30  ;;  %v6498_v33 = vld [vmem:[#allocation76_spill] sm:$0xff]  ;;  %v6501_v8 = vld [vmem:[#allocation77_spill] sm:$0xff] }
 0x2e1   : > { %v2101_v49 = vpop.permute.xlu0 %2100  ;;  %v5767_v14 = vpop.permute.xlu1 %1868  ;;  %v3126_v0 = vsel %vm3104_vm1, %v2805_v12, %v3097_v2  ;;  %v2360_v2 = vsel %vm579_vm14, %v6499_v55, %v6498_v33  ;;  %v2581_v12 = vsel %vm581_vm15, %v2580_v15, %v5499_v46  ;;  %v526_v62 = vrot.slane %v6502_v17, %v4413_v23 }
 0x2e2   : > { %3158 = vmatprep.subr.mxu1 %v3126_v0  ;;  %v5786_v60 = vrot.slane %v6496_v63, %v4413_v23  ;;  %v2361_v0 = vsel %vm581_vm15, %v2360_v2, %v6500_v32  ;;  %v755_v63 = vcombine.high %v737_v3, %v6367_v18  ;;  %v2138_v15 = vsel %vm579_vm14, %v5264_v6, %v2101_v49  ;;  %v6507_v32 = vld [vmem:[#allocation33_spill] sm:$0xff] }
 0x2e3   : > { %787 = vrot.lane.b32.xlu1 %v737_v3, %s3818_s8  ;;  %3159 = vmatpush1.msra.mxu1 %v3125_v57  ;;  %v2362_v57 = vsel %vm583_vm0, %v2361_v0, %v6501_v8  ;;  %v6503_v55 = vcombine.high %v6494_v50, %v6495_v30  ;;  %v975_v2 = vcombine.high %v957_v59, %v6367_v18  ;;  %v6505_v50 = vld [vmem:[#allocation34_spill] sm:$0xff] }
 0x2e4   : > { %568 = vrot.lane.b32.xlu0 %v529_v13, %s3817_s26  ;;  %3160 = vmatprep.subr.mxu1 %v3122_v11  ;;  %v527_v5 = vcombine.high %v5786_v60, %v6367_v18  ;;  %v2139_v43 = vsel %vm581_vm15, %v2138_v15, %v5465_v54  ;;  %v6504_v54 = vld [vmem:[#allocation79_spill] sm:$0xff] }
 0x2e5   : > { %v2089_v16 = vpop.permute.xlu0 %2088  ;;  %v5779_v28 = vpop.permute.xlu1 %2096  ;;  %v510_v3 = vrot.slane %v6503_v55, %v4413_v23  ;;  %v2140_v23 = vsel %vm583_vm0, %v2139_v43, %v5716_v48  ;;  %v1478_v30 = vsel %vm579_vm14, %v6505_v50, %v6504_v54  ;;  %v6506_v48 = vld [vmem:[#allocation78_spill] sm:$0xff] }
 0x2e6   : > { %v1475_v0 = vsel %vm579_vm14, %v6507_v32, %v6506_v48  ;;  %v6518_v54 = vld [vmem:[#allocation82_spill] sm:$0xff]  ;;  %v6523_v32 = vld [vmem:[#allocation88_spill] sm:$0xff] }
 0x2e7   : > { %1007 = vrot.lane.b32.xlu1 %v957_v59, %s3818_s8  ;;  %v528_v49 = vcombine.high %v510_v3, %v6367_v18  ;;  %v530_v59 = vcombine.high %v526_v62, %v6367_v18 }
 0x2e8   : > { %803 = vrot.lane.b32.xlu0 %v757_v4, %s3819_s18 }
 0x2e9   : > { %v2542_v45 = vpop.permute.xlu0 %2541  ;;  %v5799_v27 = vpop.permute.xlu1 %2997 }
 0x2ea   : > { %v2582_v21 = vsel %vm583_vm0, %v2581_v12, %v2542_v45  ;;  %v1918_v45 = vsel %vm579_vm14, %v5219_v19, %v5700_v56  ;;  %v2135_v19 = vsel %vm579_vm14, %v5282_v36, %v2089_v16  ;;  %v1695_v36 = vsel %vm579_vm14, %v5250_v42, %v5744_v10  ;;  %v6513_v10 = vld [vmem:[#allocation36_spill] sm:$0xff] }
 0x2eb   : > { %v3084_v58 = vrot.slane %v2582_v21, 4  ;;  %556 = vrot.lane.b32.xlu1 %v527_v5, %s3817_s26  ;;  %v1919_v5 = vsel %vm581_vm15, %v1918_v45, %v5565_v31  ;;  %v2136_v16 = vsel %vm581_vm15, %v2135_v19, %v5530_v41  ;;  %v2369_v41 = vsel %vm579_vm14, %v6513_v10, %v5203_v26  ;;  %v6529_v10 = vld [vmem:[#allocation87_spill] sm:$0xff] }
 0x2ec   : > { %1023 = vrot.lane.b32.xlu0 %v977_v24, %s3819_s18  ;;  %v3073_v24 = vrot.slane %v2140_v23, 4  ;;  %v6516_v23 = vld [vmem:[#allocation13_spill] sm:$0xff] }
 0x2ed   : > { %v1661_v46 = vpop.permute.xlu0 %1660  ;;  %v2570_v13 = vpop.permute.xlu1 %2569  ;;  %v3121_v11 = vsel %vm3104_vm1, %v2362_v57, %v3084_v58  ;;  %v6508_v58 = vld [vmem:[#allocation68_spill] sm:$0xff] }
 0x2ee   : > { %3161 = vmatpush1.msra.mxu1 %v3121_v11  ;;  %v1479_v8 = vsel %vm581_vm15, %v1478_v30, %v6508_v58  ;;  %v6509_v57 = vld [vmem:[#allocation48_spill] sm:$0xff] }
 0x2ef   : > { %791 = vrot.lane.b32.xlu1 %v755_v63, %s3819_s18  ;;  %v1249_v11 = vsel %vm579_vm14, %v6509_v57, %v5336_v38  ;;  %v6510_v63 = vld [vmem:[#allocation49_spill] sm:$0xff]  ;;  %v6511_v38 = vld [vmem:[#allocation80_spill] sm:$0xff] }
 0x2f0   : > { %572 = vrot.lane.b32.xlu0 %v526_v62, %s3818_s8  ;;  %v1246_v17 = vsel %vm579_vm14, %v6510_v63, %v5358_v39  ;;  %v1698_v62 = vsel %vm579_vm14, %v5310_v35, %v1661_v46  ;;  %v1250_v39 = vsel %vm581_vm15, %v1249_v11, %v5241_v61  ;;  %v6514_v46 = vld [vmem:[#allocation52_spill] sm:$0xff]  ;;  %v1915_v61 = vsel %vm579_vm14, %v5267_v51, %v5767_v14  ;;  %v6526_v63 = vld [vmem:[#allocation30_spill] sm:$0xff] }
 0x2f1   : > { %v3010_v4 = vpop.permute.xlu0 %3009  ;;  %v1657_v33 = vpop.permute.xlu1 %1656  ;;  %v1247_v35 = vsel %vm581_vm15, %v1246_v17, %v5269_v47  ;;  %v1251_v45 = vsel %vm583_vm0, %v1250_v39, %v5391_v9  ;;  %v1699_v47 = vsel %vm581_vm15, %v1698_v62, %v6516_v23  ;;  %v2589_v9 = vsel %vm579_vm14, %v6518_v54, %v2570_v13  ;;  %v6519_v30 = vld [vmem:[#allocation44_spill] sm:$0xff]  ;;  %v6527_v17 = vld [vmem:[#allocation26_spill] sm:$0xff] }
 0x2f2   : > { %v3029_v42 = vsel %vm579_vm14, %v5328_v20, %v3010_v4  ;;  %v2137_v20 = vsel %vm583_vm0, %v2136_v16, %v5779_v28  ;;  %v6515_v4 = vld [vmem:[#allocation21_spill] sm:$0xff]  ;;  %v1248_v13 = vsel %vm583_vm0, %v1247_v35, %v6523_v32  ;;  %v3049_v58 = vrot.slane %v1251_v45, 4 }
 0x2f3   : > { %560 = vrot.lane.b32.xlu1 %v510_v3, %s3818_s8  ;;  %v1480_v3 = vsel %vm583_vm0, %v1479_v8, %v6511_v38  ;;  %v1696_v26 = vsel %vm581_vm15, %v1695_v36, %v6515_v4  ;;  %v3030_v51 = vsel %vm581_vm15, %v3029_v42, %v6519_v30  ;;  %v6525_v8 = vld [vmem:[#allocation39_spill] sm:$0xff]  ;;  %v3072_v11 = vrot.slane %v2137_v20, 4  ;;  %v6531_v4 = vld [vmem:[#allocation84_spill] sm:$0xff] }
 0x2f4   : > { %1011 = vrot.lane.b32.xlu0 %v975_v2, %s3819_s18  ;;  %v6512_v2 = vld [vmem:[#allocation72_spill] sm:$0xff]  ;;  %v1697_v19 = vsel %vm583_vm0, %v1696_v26, %v1657_v33  ;;  %v1916_v57 = vsel %vm581_vm15, %v1915_v61, %v6525_v8  ;;  %v2590_v36 = vsel %vm581_vm15, %v2589_v9, %v6527_v17  ;;  %v6530_v61 = vld [vmem:[#allocation57_spill] sm:$0xff]  ;;  %v6536_v8 = vld [vmem:[#allocation86_spill] sm:$0xff] }
 0x2f5   : > { %v1669_v37 = vpop.permute.xlu0 %1668  ;;  %v5830_v6 = vpop.permute.xlu1 %2557  ;;  %v1476_v43 = vsel %vm581_vm15, %v1475_v0, %v6512_v2  ;;  %v3060_v16 = vrot.slane %v1697_v19, 4  ;;  %v6528_v2 = vld [vmem:[#allocation23_spill] sm:$0xff]  ;;  %v6535_v19 = vld [vmem:[#allocation56_spill] sm:$0xff] }
 0x2f6   : > { %v1700_v50 = vsel %vm583_vm0, %v1699_v47, %v1669_v37  ;;  %v6524_v37 = vld [vmem:[#allocation59_spill] sm:$0xff]  ;;  %v1477_v20 = vsel %vm583_vm0, %v1476_v43, %v6530_v61  ;;  %v6545_v61 = vld [vmem:[#allocation90_spill] sm:$0xff] }
 0x2f7   : > { %564 = vrot.lane.b32.xlu1 %v528_v49, %s3819_s18  ;;  %v1029_v49 = vsel %vm579_vm14, %v6514_v46, %v5373_v40  ;;  %v6538_v17 = vld [vmem:[#allocation35_spill] sm:$0xff] }
 0x2f8   : > { %576 = vrot.lane.b32.xlu0 %v530_v59, %s3819_s18  ;;  %v6517_v59 = vld [vmem:[#allocation50_spill] sm:$0xff]  ;;  %v1030_v0 = vsel %vm581_vm15, %v1029_v49, %v6524_v37 }
 0x2f9   : > { %v1889_v12 = vpop.permute.xlu0 %1888  ;;  %v2778_v21 = vpop.permute.xlu1 %2777  ;;  %v3026_v40 = vsel %vm579_vm14, %v6517_v59, %v5799_v27  ;;  %v3048_v59 = vrot.slane %v1248_v13, 4 }
 0x2fa   : > { %v1920_v56 = vsel %vm583_vm0, %v1919_v5, %v1889_v12  ;;  %v6520_v12 = vld [vmem:[#allocation85_spill] sm:$0xff]  ;;  %v6521_v5 = vld [vmem:[#allocation47_spill] sm:$0xff]  ;;  %v3027_v33 = vsel %vm581_vm15, %v3026_v40, %v6526_v63  ;;  %v2806_v35 = vsel %vm579_vm14, %v6529_v10, %v2778_v21  ;;  %v6532_v40 = vld [vmem:[#allocation38_spill] sm:$0xff] }
 0x2fb   : > { %v3118_v31 = vsel %vm3104_vm1, %v1920_v56, %v3073_v24  ;;  %v1026_v24 = vsel %vm579_vm14, %v6521_v5, %v6520_v12  ;;  %v6522_v56 = vld [vmem:[#allocation89_spill] sm:$0xff]  ;;  %v2807_v43 = vsel %vm581_vm15, %v2806_v35, %v5657_v1 }
 0x2fc   : > { %3162 = vmatprep.subr.mxu1 %v3118_v31  ;;  %v3061_v31 = vrot.slane %v1700_v50, 4  ;;  %v1027_v26 = vsel %vm581_vm15, %v1026_v24, %v6531_v4  ;;  %v6534_v12 = vld [vmem:[#allocation65_spill] sm:$0xff] }
 0x2fd   : > { %v2790_v15 = vpop.permute.xlu0 %2789  ;;  %v3006_v55 = vpop.permute.xlu1 %3005  ;;  %v1028_v21 = vsel %vm583_vm0, %v1027_v26, %v6532_v40  ;;  %v2370_v5 = vsel %vm581_vm15, %v2369_v41, %v6534_v12 }
 0x2fe   : > { %v2809_v48 = vsel %vm579_vm14, %v6522_v56, %v2790_v15  ;;  %v3028_v46 = vsel %vm583_vm0, %v3027_v33, %v3006_v55  ;;  %v3114_v55 = vsel %vm3104_vm1, %v1480_v3, %v3061_v31  ;;  %v2371_v56 = vsel %vm583_vm0, %v2370_v5, %v6535_v19  ;;  %v6537_v33 = vld [vmem:[#allocation55_spill] sm:$0xff] }
 0x2ff   : > { %v2810_v39 = vsel %vm581_vm15, %v2809_v48, %v6528_v2  ;;  %v3098_v9 = vrot.slane %v3028_v46, 4  ;;  %v3109_v1 = vsel %vm3104_vm1, %v1028_v21, %v3048_v59  ;;  %v6541_v2 = vld [vmem:[#allocation81_spill] sm:$0xff]  ;;  %v6543_v46 = vld [vmem:[#allocation63_spill] sm:$0xff] }
 0x300   : > { %v6550_v5 = vld [vmem:[#allocation51_spill] sm:$0xff] }
 0x301   : > { %v3018_v14 = vpop.permute.xlu0 %3017  ;;  %v2578_v28 = vpop.permute.xlu1 %2577 }
 0x302   : > { %v3031_v27 = vsel %vm583_vm0, %v3030_v51, %v3018_v14  ;;  %v2591_v15 = vsel %vm583_vm0, %v2590_v36, %v2578_v28  ;;  %v3113_v51 = vsel %vm3104_vm1, %v1477_v20, %v3060_v16  ;;  %v6533_v14 = vld [vmem:[#allocation91_spill] sm:$0xff]  ;;  %v2366_v36 = vsel %vm579_vm14, %v6538_v17, %v6537_v33  ;;  %v6539_v16 = vld [vmem:[#allocation58_spill] sm:$0xff] }
 0x303   : > { %v3099_v62 = vrot.slane %v3031_v27, 4  ;;  %v3087_v54 = vrot.slane %v2591_v15, 4  ;;  %v1031_v28 = vsel %vm583_vm0, %v1030_v0, %v6533_v14  ;;  %v6555_v33 = vld [vmem:[#allocation27_spill] sm:$0xff] }
 0x304   : > { %v3110_v3 = vsel %vm3104_vm1, %v1031_v28, %v3049_v58  ;;  %v6549_v28 = vld [vmem:[#allocation54_spill] sm:$0xff] }
 0x305   : > { %v1877_v38 = vpop.permute.xlu0 %1876  ;;  %v2798_v42 = vpop.permute.xlu1 %2797  ;;  %v3124_v27 = vsel %vm3104_vm1, %v2371_v56, %v3087_v54 }
 0x306   : > { %v1917_v49 = vsel %vm583_vm0, %v1916_v57, %v1877_v38  ;;  %v2811_v45 = vsel %vm583_vm0, %v2810_v39, %v2798_v42  ;;  %v2586_v57 = vsel %vm579_vm14, %v6536_v8, %v5830_v6  ;;  %v6542_v6 = vld [vmem:[#allocation67_spill] sm:$0xff] }
 0x307   : > { %v3117_v23 = vsel %vm3104_vm1, %v1917_v49, %v3072_v11  ;;  %v3128_v47 = vsel %vm3104_vm1, %v2811_v45, %v3099_v62  ;;  %v2587_v11 = vsel %vm581_vm15, %v2586_v57, %v5634_v29  ;;  %v6540_v62 = vld [vmem:[#allocation42_spill] sm:$0xff]  ;;  %v2367_v10 = vsel %vm581_vm15, %v2366_v36, %v6542_v6  ;;  %v6544_v49 = vld [vmem:[#allocation29_spill] sm:$0xff] }
 0x308   : > { %3163 = vmatpush1.msra.mxu1 %v3117_v23  ;;  %3235 = vmatprep.subr.mxu0 %v3128_v47  ;;  %v809_v15 = vsel %vm579_vm14, %v6540_v62, %v6539_v16  ;;  %v585_v45 = vsel %vm579_vm14, %v6544_v49, %v6543_v46  ;;  %v6546_v47 = vld [vmem:[#allocation61_spill] sm:$0xff]  ;;  %v6557_v46 = vld [vmem:[#allocation14_spill] sm:$0xff] }
 0x309   : > { %v2125_v50 = vpop.permute.xlu0 %2124  ;;  %3164 = vmatprep.subr.mxu1 %v3114_v55  ;;  %v2786_v30 = vpop.permute.xlu1 %2785  ;;  %v810_v39 = vsel %vm581_vm15, %v809_v15, %v6541_v2  ;;  %v586_v59 = vsel %vm581_vm15, %v585_v45, %v6546_v47 }
 0x30a   : > { %v2808_v24 = vsel %vm583_vm0, %v2807_v43, %v2786_v30  ;;  %3165 = vmatpush1.msra.mxu1 %v3113_v51  ;;  %v811_v20 = vsel %vm583_vm0, %v810_v39, %v6545_v61  ;;  %v6547_v30 = vld [vmem:[#allocation83_spill] sm:$0xff]  ;;  %v6548_v51 = vld [vmem:[#allocation45_spill] sm:$0xff]  ;;  %v2144_v12 = vsel %vm579_vm14, %v6549_v28, %v2125_v50 }
 0x30b   : > { %3166 = vmatprep.subr.mxu1 %v3110_v3  ;;  %v3127_v48 = vsel %vm3104_vm1, %v2808_v24, %v3098_v9  ;;  %v3037_v23 = vrot.slane %v811_v20, 4  ;;  %v806_v14 = vsel %vm579_vm14, %v6548_v51, %v6547_v30  ;;  %v6551_v3 = vld [vmem:[#allocation12_spill] sm:$0xff]  ;;  %v6559_v51 = vld [vmem:[#allocation53_spill] sm:$0xff] }
 0x30c   : > { %3167 = vmatpush1.msra.mxu1 %v3109_v1  ;;  %3236 = vmatpush1.msra.mxu0 %v3127_v48  ;;  %v807_v24 = vsel %vm581_vm15, %v806_v14, %v6550_v5  ;;  %v2145_v19 = vsel %vm581_vm15, %v2144_v12, %v6551_v3  ;;  %v6552_v48 = vld [vmem:[#allocation64_spill] sm:$0xff] }
 0x30d   : > { %v2113_v32 = vpop.permute.xlu0 %2112  ;;  %3237 = vmatprep.subr.mxu0 %v3124_v27  ;;  %v5951_v41 = vpop.permute.xlu1 %1684  ;;  %v808_v27 = vsel %vm583_vm0, %v807_v24, %v6552_v48  ;;  %v6560_v5 = vld [vmem:[#allocation28_spill] sm:$0xff] }
 0x30e   : > { %v3036_v17 = vrot.slane %v808_v27, 4 }
 0x311   : > { %v2566_v13 = vpop.permute.xlu0 %2565  ;;  %v5953_v37 = vpop.permute.xlu1 %1672 }
 0x312   : > { %v2588_v38 = vsel %vm583_vm0, %v2587_v11, %v2566_v13  ;;  %v6553_v13 = vld [vmem:[#allocation41_spill] sm:$0xff]  ;;  %v6554_v11 = vld [vmem:[#allocation60_spill] sm:$0xff] }
 0x313   : > { %v3086_v42 = vrot.slane %v2588_v38, 4  ;;  %v580_v50 = vsel %vm579_vm14, %v6555_v33, %v6554_v11 }
 0x315   : > { %v1905_v0 = vpop.permute.xlu0 %1904  ;;  %v5955_v58 = vpop.permute.xlu1 %1892 }
 0x316   : > { %v1924_v8 = vsel %vm579_vm14, %v6553_v13, %v1905_v0  ;;  %v6010_v0 = vld [vmem:[#allocation5] sm:$0xff] }
 0x317   : > { %v1925_v62 = vsel %vm581_vm15, %v1924_v8, %v5690_v44 }
 0x319   : > { %v2133_v31 = vpop.permute.xlu0 %2132  ;;  %v2121_v63 = vpop.permute.xlu1 %2120 }
 0x31a   : > { %v2146_v57 = vsel %vm583_vm0, %v2145_v19, %v2133_v31 }
 0x31b   : > { %v3075_v36 = vrot.slane %v2146_v57, 4 }
 0x31d   : > { %v2346_v29 = vpop.permute.xlu0 %2345  ;;  %v537_v35 = vpop.permute.xlu1 %536 }
 0x31e   : > { %v2368_v4 = vsel %vm583_vm0, %v2367_v10, %v2346_v29  ;;  %v582_v16 = vsel %vm581_vm15, %v580_v50, %v537_v35  ;;  %v6556_v10 = vld [vmem:[#allocation37_spill] sm:$0xff]  ;;  %v6021_v35 = vld [vmem:[#allocation5 + $0x8] sm:$0xff] }
 0x31f   : > { %v3123_v26 = vsel %vm3104_vm1, %v2368_v4, %v3086_v42  ;;  %v2141_v29 = vsel %vm579_vm14, %v6556_v10, %v2113_v32  ;;  %v6558_v4 = vld [vmem:[#allocation22_spill] sm:$0xff] }
 0x320   : > { %3238 = vmatpush1.msra.mxu0 %v3123_v26  ;;  %v2142_v49 = vsel %vm581_vm15, %v2141_v29, %v6557_v46  ;;  %v1921_v26 = vsel %vm579_vm14, %v6558_v4, %v5955_v58  ;;  %v6562_v50 = vld [vmem:[#allocation46_spill] sm:$0xff] }
 0x321   : > { %v553_v40 = vpop.permute.xlu0 %552  ;;  %v5982_v21 = vpop.permute.xlu1 %1235  ;;  %v2143_v20 = vsel %vm583_vm0, %v2142_v49, %v2121_v63  ;;  %v1704_v63 = vsel %vm579_vm14, %v6559_v51, %v5951_v41 }
 0x322   : > { %v587_v54 = vsel %vm583_vm0, %v586_v59, %v553_v40  ;;  %v1705_v14 = vsel %vm581_vm15, %v1704_v63, %v5675_v7  ;;  %v6561_v7 = vld [vmem:[#allocation92_spill] sm:$0xff] }
 0x323   : > { %v3106_v55 = vsel %vm3104_vm1, %v587_v54, %v3037_v23  ;;  %v3074_v23 = vrot.slane %v2143_v20, 4  ;;  %v1701_v57 = vsel %vm579_vm14, %v6561_v7, %v5953_v37 }
 0x324   : > { %3168 = vmatprep.subr.mxu1 %v3106_v55 }
 0x325   : > { %v1465_v9 = vpop.permute.xlu0 %1464  ;;  %v5986_v43 = vpop.permute.xlu1 %1676 }
 0x326   : > { %v1484_v24 = vsel %vm579_vm14, %v6560_v5, %v1465_v9 }
 0x329   : > { %v1693_v56 = vpop.permute.xlu0 %1692  ;;  %v1897_v1 = vpop.permute.xlu1 %1896 }
 0x32a   : > { %v1922_v32 = vsel %vm581_vm15, %v1921_v26, %v1897_v1  ;;  %v1706_v12 = vsel %vm583_vm0, %v1705_v14, %v1693_v56  ;;  %v1702_v56 = vsel %vm581_vm15, %v1701_v57, %v5986_v43  ;;  %v6563_v43 = vld [vmem:[#allocation11_spill] sm:$0xff] }
 0x32b   : > { %v3063_v3 = vrot.slane %v1706_v12, 4 }
 0x32d   : > { %v1913_v15 = vpop.permute.xlu0 %1912  ;;  %v541_v38 = vpop.permute.xlu1 %540 }
 0x32e   : > { %v1926_v2 = vsel %vm583_vm0, %v1925_v62, %v1913_v15  ;;  %v584_v39 = vsel %vm583_vm0, %v582_v16, %v541_v38 }
 0x32f   : > { %v3105_v31 = vsel %vm3104_vm1, %v584_v39, %v3036_v17  ;;  %v3120_v42 = vsel %vm3104_vm1, %v1926_v2, %v3075_v36 }
 0x330   : > { %3169 = vmatpush1.msra.mxu1 %v3105_v31  ;;  %3239 = vmatprep.subr.mxu0 %v3120_v42  ;;  %v1255_v31 = vsel %vm579_vm14, %v6563_v43, %v5982_v21  ;;  %v6564_v21 = vld [vmem:[#allocation24_spill] sm:$0xff] }
 0x331   : > { %v6014_v6 = vpop.permute.xlu0 %1223  ;;  %3570 = vmatmul.mubr.msk.f32.vlgmr.msra.gmra.mxu1 %vm3131_vm2, %v6010_v0  ;;  %v1240_v44 = vpop.permute.xlu1 %1239 }
 0x332   : > { %3208 = vmatprep.mubr.f32.mxu1 %v6367_v18  ;;  %v1256_v10 = vsel %vm581_vm15, %v1255_v31, %v1240_v44 }
 0x335   : > { %v1453_v45 = vpop.permute.xlu0 %1452  ;;  %3571 = vmatmul.mubr.msk.f32.gmra.mxu1 %vm3131_vm2, %v6021_v35  ;;  %v1469_v61 = vpop.permute.xlu1 %1468 }
 0x336   : > { %v1485_v19 = vsel %vm581_vm15, %v1484_v24, %v1469_v61  ;;  %v1481_v17 = vsel %vm579_vm14, %v6562_v50, %v1453_v45 }
 0x339   : > { %v1681_v47 = vpop.permute.xlu0 %1680  ;;  %v1901_v59 = vpop.permute.xlu1 %1900 }
 0x33a   : > { %v1923_v40 = vsel %vm583_vm0, %v1922_v32, %v1901_v59  ;;  %v1703_v33 = vsel %vm583_vm0, %v1702_v56, %v1681_v47  ;;  %v1252_v32 = vsel %vm579_vm14, %v6564_v21, %v6014_v6 }
 0x33b   : > { %v3119_v54 = vsel %vm3104_vm1, %v1923_v40, %v3074_v23  ;;  %v3062_v36 = vrot.slane %v1703_v33, 4 }
 0x33c   : > { %3240 = vmatpush1.msra.mxu0 %v3119_v54 }
 0x33d   : > { %v796_v55 = vpop.permute.xlu0 %795  ;;  %v1016_v30 = vpop.permute.xlu1 %1015 }
 0x33e   : > { %v1035_v49 = vsel %vm579_vm14, %v5644_v25, %v1016_v30  ;;  %v815_v54 = vsel %vm579_vm14, %v5641_v22, %v796_v55 }
 0x341   : > { %v1228_v58 = vpop.permute.xlu0 %1227  ;;  %v1244_v28 = vpop.permute.xlu1 %1243 }
 0x342   : > { %v1257_v46 = vsel %vm583_vm0, %v1256_v10, %v1244_v28  ;;  %v1253_v47 = vsel %vm581_vm15, %v1252_v32, %v1228_v58 }
 0x343   : > { %v3051_v61 = vrot.slane %v1257_v46, 4 }
 0x345   : > { %v1457_v1 = vpop.permute.xlu0 %1456  ;;  %v1473_v48 = vpop.permute.xlu1 %1472 }
 0x346   : > { %v1486_v27 = vsel %vm583_vm0, %v1485_v19, %v1473_v48  ;;  %v1482_v16 = vsel %vm581_vm15, %v1481_v17, %v1457_v1 }
 0x347   : > { %v3116_v13 = vsel %vm3104_vm1, %v1486_v27, %v3063_v3 }
 0x348   : > { %3241 = vmatprep.subr.mxu0 %v3116_v13 }
 0x349   : > { %v784_v41 = vpop.permute.xlu0 %783  ;;  %v800_v8 = vpop.permute.xlu1 %799 }
 0x34a   : > { %v812_v40 = vsel %vm579_vm14, %v5694_v52, %v784_v41  ;;  %v816_v6 = vsel %vm581_vm15, %v815_v54, %v800_v8 }
 0x34d   : > { %v1004_v9 = vpop.permute.xlu0 %1003  ;;  %v1020_v11 = vpop.permute.xlu1 %1019 }
 0x34e   : > { %v1036_v20 = vsel %vm581_vm15, %v1035_v49, %v1020_v11  ;;  %v1032_v30 = vsel %vm579_vm14, %v5706_v34, %v1004_v9 }
 0x351   : > { %v1232_v62 = vpop.permute.xlu0 %1231  ;;  %v1461_v15 = vpop.permute.xlu1 %1460 }
 0x352   : > { %v1483_v38 = vsel %vm583_vm0, %v1482_v16, %v1461_v15  ;;  %v1254_v25 = vsel %vm583_vm0, %v1253_v47, %v1232_v62 }
 0x353   : > { %v3115_v2 = vsel %vm3104_vm1, %v1483_v38, %v3062_v36  ;;  %v3050_v14 = vrot.slane %v1254_v25, 4 }
 0x354   : > { %3242 = vmatpush1.msra.mxu0 %v3115_v2 }
 0x355   : > { %v788_v37 = vpop.permute.xlu1 %787 }
 0x356   : > { %v569_v39 = vpop.permute.xlu0 %568  ;;  %v813_v51 = vsel %vm581_vm15, %v812_v40, %v788_v37 }
 0x357   : > { %v591_v55 = vsel %vm579_vm14, %v5757_v53, %v569_v39 }
 0x359   : > { %v1008_v42 = vpop.permute.xlu1 %1007 }
 0x35a   : > { %v804_v29 = vpop.permute.xlu0 %803  ;;  %v1033_v58 = vsel %vm581_vm15, %v1032_v30, %v1008_v42 }
 0x35b   : > { %v817_v5 = vsel %vm583_vm0, %v816_v6, %v804_v29 }
 0x35c   : > { %v3039_v1 = vrot.slane %v817_v5, 4 }
 0x35d   : > { %v557_v45 = vpop.permute.xlu1 %556 }
 0x35e   : > { %v1024_v4 = vpop.permute.xlu0 %1023  ;;  %v588_v22 = vsel %vm579_vm14, %v5786_v60, %v557_v45 }
 0x35f   : > { %v1037_v26 = vsel %vm583_vm0, %v1036_v20, %v1024_v4 }
 0x360   : > { %v3112_v23 = vsel %vm3104_vm1, %v1037_v26, %v3051_v61 }
 0x361   : > { %3243 = vmatprep.subr.mxu0 %v3112_v23  ;;  %v792_v44 = vpop.permute.xlu1 %791 }
 0x362   : > { %v573_v59 = vpop.permute.xlu0 %572  ;;  %v814_v28 = vsel %vm583_vm0, %v813_v51, %v792_v44 }
 0x363   : > { %v3038_v24 = vrot.slane %v814_v28, 4  ;;  %v592_v48 = vsel %vm581_vm15, %v591_v55, %v573_v59 }
 0x365   : > { %v561_v63 = vpop.permute.xlu1 %560 }
 0x366   : > { %v1012_v12 = vpop.permute.xlu0 %1011  ;;  %v589_v3 = vsel %vm581_vm15, %v588_v22, %v561_v63 }
 0x367   : > { %v1034_v52 = vsel %vm583_vm0, %v1033_v58, %v1012_v12 }
 0x368   : > { %v3111_v34 = vsel %vm3104_vm1, %v1034_v52, %v3050_v14 }
 0x369   : > { %3244 = vmatpush1.msra.mxu0 %v3111_v34  ;;  %v565_v19 = vpop.permute.xlu1 %564 }
 0x36a   : > { %v577_v27 = vpop.permute.xlu0 %576  ;;  %v590_v13 = vsel %vm583_vm0, %v589_v3, %v565_v19 }
 0x36b   : > { %v593_v41 = vsel %vm583_vm0, %v592_v48, %v577_v27  ;;  %v3107_v60 = vsel %vm3104_vm1, %v590_v13, %v3038_v24 }
 0x36c   : > { %v3108_v8 = vsel %vm3104_vm1, %v593_v41, %v3039_v1 }
 0x36d   : > { %3245 = vmatprep.subr.mxu0 %v3108_v8 }
 0x36e   : > { %3246 = vmatpush1.msra.mxu0 %v3107_v60 }
 0x36f   : > { %3572 = vmatmul.mubr.msk.f32.vlgmr.msra.gmra.mxu0 %vm3131_vm2, %v6010_v0 }
 0x370   : > { %3285 = vmatprep.mubr.f32.mxu0 %v6367_v18 }
 0x373   : > { %3573 = vmatmul.mubr.msk.f32.gmra.mxu0 %vm3131_vm2, %v6021_v35 }
 0x3f1   : > { %v3204_v53 = vpop.f32.mrf.mxu1 }
 0x3f2   : > { %3309 = vrot.lane.b32.xlu0 %v3204_v53, %s3819_s18  ;;  %3303 = vrot.lane.b32.xlu1 %v3204_v53, %s3818_s8 }
 0x3f3   : > { %v3206_v7 = vpop.f32.mrf.mxu1 }
 0x3f5   : > { %v3210_v57 = vpop.f32.mrf.mxu1 }
 0x3f6   : > { %3293 = vrot.lane.b32.xlu0 %v3210_v57, %s3817_s26  ;;  %3297 = vrot.lane.b32.xlu1 %v3204_v53, %s3817_s26 }
 0x3f7   : > { %v3212_v35 = vpop.f32.mrf.mxu1 }
 0x3fa   : > { %3306 = vrot.lane.b32.xlu0 %v3210_v57, %s3819_s18 }
 0x42f   : > { %v3281_v56 = vpop.f32.mrf.mxu0 }
 0x430   : > { %3349 = vrot.lane.b32.xlu1 %v3281_v56, %s3817_s26 }
 0x431   : > { %v6105_v18 = vpop.f32.mrf.mxu0 }
 0x433   : > { %v6107_v0 = vpop.f32.mrf.mxu0 }
 0x434   : > { %3355 = vrot.lane.b32.xlu1 %v3281_v56, %s3818_s8  ;;  %3345 = vrot.lane.b32.xlu0 %v6107_v0, %s3817_s26 }
 0x435   : > { %v6124_v9 = vpop.f32.mrf.mxu0 }
 0x438   : > { %3361 = vrot.lane.b32.xlu1 %v3281_v56, %s3819_s18  ;;  %3352 = vrot.lane.b32.xlu0 %v6107_v0, %s3818_s8 }
 0x43c   : > { %3317 = vrot.lane.b32.xlu1 %v3206_v7, %s3817_s26  ;;  %3358 = vrot.lane.b32.xlu0 %v6107_v0, %s3819_s18 }
 0x440   : > { %3323 = vrot.lane.b32.xlu1 %v3206_v7, %s3818_s8  ;;  %3313 = vrot.lane.b32.xlu0 %v3212_v35, %s3817_s26 }
 0x444   : > { %3329 = vrot.lane.b32.xlu1 %v3206_v7, %s3819_s18  ;;  %3320 = vrot.lane.b32.xlu0 %v3212_v35, %s3818_s8 }
 0x448   : > { %3300 = vrot.lane.b32.xlu1 %v3210_v57, %s3818_s8  ;;  %3326 = vrot.lane.b32.xlu0 %v3212_v35, %s3819_s18 }
 0x44c   : > { %3369 = vrot.lane.b32.xlu1 %v6105_v18, %s3817_s26  ;;  %3365 = vrot.lane.b32.xlu0 %v6124_v9, %s3817_s26 }
 0x450   : > { %3375 = vrot.lane.b32.xlu1 %v6105_v18, %s3818_s8  ;;  %3372 = vrot.lane.b32.xlu0 %v6124_v9, %s3818_s8 }
 0x454   : > { %3381 = vrot.lane.b32.xlu1 %v6105_v18, %s3819_s18  ;;  %3378 = vrot.lane.b32.xlu0 %v6124_v9, %s3819_s18 }
 0x464   : > { %v3310_v11 = vpop.permute.xlu0 %3309  ;;  %v3304_v33 = vpop.permute.xlu1 %3303 }
 0x468   : > { %v3294_v50 = vpop.permute.xlu0 %3293  ;;  %v3298_v17 = vpop.permute.xlu1 %3297 }
 0x469   : > { %v3332_v49 = vsel %vm579_vm14, %v3204_v53, %v3294_v50 }
 0x46a   : > { %v3333_v20 = vsel %vm581_vm15, %v3332_v49, %v3298_v17 }
 0x46c   : > { %v3307_v36 = vpop.permute.xlu0 %3306 }
 0x46d   : > { %v3335_v42 = vsel %vm579_vm14, %v3304_v33, %v3307_v36 }
 0x46e   : > { %v3336_v10 = vsel %vm581_vm15, %v3335_v42, %v3310_v11 }
 0x46f   : > { %v6143_v61 = vsel %vm583_vm0, %v3336_v10, %v3210_v57 }
 0x470   : > { %v3407_v40 = vmul.f32 %v6143_v61, %v6143_v61 }
 0x4a2   : > { %v3350_v16 = vpop.permute.xlu1 %3349 }
 0x4a6   : > { %v3346_v62 = vpop.permute.xlu0 %3345  ;;  %v3356_v15 = vpop.permute.xlu1 %3355 }
 0x4a7   : > { %v3384_v4 = vsel %vm579_vm14, %v3281_v56, %v3346_v62 }
 0x4a8   : > { %v3385_v51 = vsel %vm581_vm15, %v3384_v4, %v3350_v16 }
 0x4aa   : > { %v3353_v38 = vpop.permute.xlu0 %3352  ;;  %v3362_v2 = vpop.permute.xlu1 %3361 }
 0x4ab   : > { %v3386_v52 = vsel %vm583_vm0, %v3385_v51, %v3353_v38 }
 0x4ac   : > { %v3410_v19 = vmul.f32 %v3386_v52, %v3386_v52 }
 0x4ae   : > { %v3359_v37 = vpop.permute.xlu0 %3358  ;;  %v3318_v39 = vpop.permute.xlu1 %3317 }
 0x4af   : > { %v3387_v32 = vsel %vm579_vm14, %v3356_v15, %v3359_v37 }
 0x4b0   : > { %v3388_v6 = vsel %vm581_vm15, %v3387_v32, %v3362_v2 }
 0x4b1   : > { %v3389_v24 = vsel %vm583_vm0, %v3388_v6, %v6107_v0 }
 0x4b2   : > { %v3314_v43 = vpop.permute.xlu0 %3313  ;;  %v3324_v31 = vpop.permute.xlu1 %3323  ;;  %v3411_v41 = vmul.f32 %v3389_v24, %v3389_v24 }
 0x4b3   : > { %v3338_v45 = vsel %vm579_vm14, %v3206_v7, %v3314_v43 }
 0x4b4   : > { %v3339_v26 = vsel %vm581_vm15, %v3338_v45, %v3318_v39 }
 0x4b6   : > { %v3321_v29 = vpop.permute.xlu0 %3320  ;;  %v3330_v46 = vpop.permute.xlu1 %3329 }
 0x4b7   : > { %v6150_v44 = vsel %vm583_vm0, %v3339_v26, %v3321_v29 }
 0x4b8   : > { %v3408_v14 = vmul.f32 %v6150_v44, %v6150_v44 }
 0x4ba   : > { %v3327_v23 = vpop.permute.xlu0 %3326  ;;  %v3301_v21 = vpop.permute.xlu1 %3300 }
 0x4bb   : > { %v3341_v47 = vsel %vm579_vm14, %v3324_v31, %v3327_v23  ;;  %v6154_v59 = vsel %vm583_vm0, %v3333_v20, %v3301_v21 }
 0x4bc   : > { %v3342_v25 = vsel %vm581_vm15, %v3341_v47, %v3330_v46  ;;  %v3396_v54 = vadd.f32 %v6143_v61, %v6154_v59  ;;  %v3406_v30 = vmul.f32 %v6154_v59, %v6154_v59 }
 0x4bd   : > { %v3343_v63 = vsel %vm583_vm0, %v3342_v25, %v3212_v35 }
 0x4be   : > { %v3397_v58 = vadd.f32 %v3396_v54, %v6150_v44  ;;  %v3414_v28 = vadd.f32 %v3407_v40, %v3406_v30  ;;  %v3366_v12 = vpop.permute.xlu0 %3365  ;;  %v3370_v5 = vpop.permute.xlu1 %3369  ;;  %v3409_v22 = vmul.f32 %v3343_v63, %v3343_v63 }
 0x4bf   : > { %v3390_v3 = vsel %vm579_vm14, %v6105_v18, %v3366_v12 }
 0x4c0   : > { %v3398_v34 = vadd.f32 %v3397_v58, %v3343_v63  ;;  %v3415_v55 = vadd.f32 %v3414_v28, %v3408_v14  ;;  %v3391_v60 = vsel %vm581_vm15, %v3390_v3, %v3370_v5 }
 0x4c2   : > { %v3416_v1 = vadd.f32 %v3415_v55, %v3409_v22  ;;  %v3373_v48 = vpop.permute.xlu0 %3372  ;;  %v3399_v27 = vadd.f32 %v3398_v34, %v3386_v52  ;;  %v3376_v13 = vpop.permute.xlu1 %3375 }
 0x4c3   : > { %v3392_v7 = vsel %vm583_vm0, %v3391_v60, %v3373_v48 }
 0x4c4   : > { %v3400_v8 = vadd.f32 %v3399_v27, %v3389_v24  ;;  %v3417_v53 = vadd.f32 %v3416_v1, %v3410_v19  ;;  %v3412_v33 = vmul.f32 %v3392_v7, %v3392_v7 }
 0x4c6   : > { %v3379_v57 = vpop.permute.xlu0 %3378  ;;  %v3382_v56 = vpop.permute.xlu1 %3381  ;;  %v3418_v35 = vadd.f32 %v3417_v53, %v3411_v41  ;;  %v3401_v11 = vadd.f32 %v3400_v8, %v3392_v7 }
 0x4c7   : > { %v3393_v0 = vsel %vm579_vm14, %v3376_v13, %v3379_v57 }
 0x4c8   : > { %v3394_v18 = vsel %vm581_vm15, %v3393_v0, %v3382_v56  ;;  %v3419_v16 = vadd.f32 %v3418_v35, %v3412_v33 }
 0x4c9   : > { %v3395_v50 = vsel %vm583_vm0, %v3394_v18, %v6124_v9 }
 0x4ca   : > { %v3402_v17 = vadd.f32 %v3401_v11, %v3395_v50  ;;  %v3413_v36 = vmul.f32 %v3395_v50, %v3395_v50 }
 0x4cc   : > { %3403 = vadd.xlane.f32.xlu0 %v3402_v17  ;;  %v3420_v62 = vadd.f32 %v3419_v16, %v3413_v36 }
 0x4ce   : > { %3421 = vadd.xlane.f32.xlu1 %v3420_v62 }
 0x555   : > { %v3404_v15 = vpop.xlane.xlu0 %3403 }
 0x556   : > { %v3405_v38 = vmul.f32 0.0009765625, %v3404_v15 }
 0x557   : > { %v3422_v2 = vpop.xlane.xlu1 %3421 }
 0x558   : > { %v3423_v37 = vmul.f32 0.0009765625, %v3422_v2  ;;  %v3424_v39 = vmul.f32 %v3405_v38, %v3405_v38  ;;  %v3426_v42 = vsub.f32 %v6154_v59, %v3405_v38  ;;  %v3427_v9 = vsub.f32 %v6143_v61, %v3405_v38 }
 0x559   : > { %v3428_v10 = vsub.f32 %v6150_v44, %v3405_v38  ;;  %v3429_v29 = vsub.f32 %v3343_v63, %v3405_v38  ;;  %v3430_v49 = vsub.f32 %v3386_v52, %v3405_v38  ;;  %v3431_v45 = vsub.f32 %v3389_v24, %v3405_v38 }
 0x55a   : > { %v3425_v43 = vsub.f32 %v3423_v37, %v3424_v39  ;;  %v3432_v20 = vsub.f32 %v3392_v7, %v3405_v38  ;;  %v3433_v4 = vsub.f32 %v3395_v50, %v3405_v38 }
 0x55c   : > { %v3434_v31 = vadd.f32 1e-05, %v3425_v43 }
 0x55e   : > { %3680 = vrsqrt.f32 %v3434_v31 }
 0x56b   : > { %v3681_v46 = vpop.eup %3680 }
 0x56c   : > { %v3436_v26 = vmul.f32 %v3681_v46, %v3426_v42  ;;  %v3437_v23 = vmul.f32 %v3681_v46, %v3427_v9  ;;  %v3438_v21 = vmul.f32 %v3681_v46, %v3428_v10  ;;  %v3439_v32 = vmul.f32 %v3681_v46, %v3429_v29 }
 0x56d   : > { %v3440_v47 = vmul.f32 %v3681_v46, %v3430_v49  ;;  %v3441_v59 = vmul.f32 %v3681_v46, %v3431_v45  ;;  %v3442_v61 = vmul.f32 %v3681_v46, %v3432_v20  ;;  %v3443_v44 = vmul.f32 %v3681_v46, %v3433_v4 }
 0x56e   : > { %3444 = vst [vmem:[%s176_s24] sm:$0xff] %v3436_v26  ;;  %3445 = vst [vmem:[%s176_s24 + $0x8] sm:$0xff] %v3437_v23 }
 0x56f   : > { %3446 = vst [vmem:[%s176_s24 + $0x10] sm:$0xff] %v3438_v21  ;;  %3447 = vst [vmem:[%s176_s24 + $0x18] sm:$0xff] %v3439_v32 }
 0x570   : > { %3448 = vst [vmem:[%s176_s24 + $0x20] sm:$0xff] %v3440_v47  ;;  %3449 = vst [vmem:[%s176_s24 + $0x28] sm:$0xff] %v3441_v59 }
 0x571   : > { %3450 = vst [vmem:[%s176_s24 + $0x30] sm:$0xff] %v3442_v61  ;;  %3451 = vst [vmem:[%s176_s24 + $0x38] sm:$0xff] %v3443_v44 }
 0x572   : > { %3749 = shalt.err (!%p3746_p0)
}
 0x573   : > { %s3750_s23 = scalar_lea.hbm %s6189_s4, 1024  ;;  %s3754_s15 = scalar_lea.hbm %s6234_s2, 2048 }
 0x574   : > { %p3751_p5 = scmp.ne.s32.totalorder %s6189_s4, %s3750_s23  ;;  %p3755_p4 = scmp.lt.s32.totalorder %s6189_s4, %s6234_s2 }
 0x575   : > { %p3756_p6 = scmp.lt.s32.totalorder %s3754_s15, %s3750_s23 }
 0x576   : > { %p3752_p2 = pnand %p3751_p5, %p6565_p11 }
 0x577   : > { %p3757_p8 = por %p3756_p6, %p3755_p4 }
 0x578   : > { %p3753_p1 = pneg %p3752_p2 }
 0x57a   : > { %p3758_p3 = pnand %p3757_p8, %p3753_p1 }
 0x57c   : > { %3761 = shalt.err (!%p3758_p3)
}
 0x57d   : > { %3617 = dma.vmem_to_hbm [thread:$0]  (%p6565_p11), %s6191_s27, 1024, %s6189_s4, %s3453_s3  }
 0x57e PF: > { %s3479_s26 = sand.u32 1, %s3792_s9   ;;  %p6566_p7 = scmp.ne.s32.totalorder %s6319_s16, 0 }
 0x57f   : > { %p6567_p9 = scmp.ge.s32.totalorder %s3804_s12, 2  ;;  %s3480_s8 = scalar_lea.sflag [#allocation4], %s3479_s26 }
 0x581   : > { %p3628_p10 = pnand %p6567_p9, %p6566_p7 }
 0x583   : > { %p3629_p12 = pneg %p3628_p10 }
 0x585   : > { %3787 = dma.done.wait (%p3629_p12), %s3480_s8, 1024  }
 0x586   : > { %3789 = vsyncadd (%p3629_p12), %s3480_s8, 4294966272  ;;  %p16_p13 = scmp.ge.s32.totalorder %s3890_s21, 4   ;;  %s6568_s9 = smov %s3796_s10 }
 0x587   : > { %s6569_s10 = smov %s3800_s11  ;;  %s6570_s11 = smov %s3910_s29 }
 0x588   : > { %s6571_s12 = smov %s3890_s21  ;;  %18 = sbr.rel (!%p16_p13) target bundleno = 6 (0x6), region = 77 }
 0x58d   :  { %3485 = vsyncpa [#allocation3], 1 }
 0x58e   :  { %3487 = vsyncpa [#allocation3 + $0x1], 1 }
 0x58f   :  { %3488 = vsyncpa [#allocation6], 1 }
 0x590   :  { %3489 = vsyncpa [#allocation4], 1 }
 0x591   :  { %3491 = vsyncpa [#allocation4 + $0x1], 1 }

</bundles_post_ra>
